<compile_context>
chip_gen: v6e
topology: v6e:2x2x1
jax: 0.10.0
libtpu: 0.0.40
codegen_flags: <defaults>
</compile_context>

<pallas_src>
import math

import jax
import jax.numpy as jnp
from jax.experimental import pallas as pl
from jax.experimental.pallas import tpu as pltpu

# ----------------------------- configuration -----------------------------
B = 2            # batch
C_SPEC = 8       # spectral channels (stand-in for 125)
H_IN = W_IN = 6  # input spatial
RB = CB = 2      # row_blocks / column_blocks (stand-in for 6)
S = 16           # spatial_dim (stand-in for 384)
PATCH = 8        # ViT patch size (stand-in for 16)
D = 128          # hidden dim (lane-dense; stand-in for 768)
NUM_HEADS = 4
HEAD_DIM = D // NUM_HEADS
MLP = 2 * D
NUM_LAYERS = 2   # stand-in for 12 encoder blocks
NUM_CLASSES = 1
N_PATCH = (S // PATCH) ** 2
TOKENS = N_PATCH + 1
T_PAD = ((TOKENS + 7) // 8) * 8      # pad tokens to the 8-sublane grain (5 -> 8)
LN_EPS = 1e-6                        # torchvision ViT uses LayerNorm(eps=1e-6)
_SQRT_2_OVER_PI = 0.7978845608028654
NEG_INF = -1e30

# derived constants for the reshape-free SpatialConcatenation kernel
assert H_IN % CB == 0
GROUP = RB * CB                      # channels per RGB group after the 1x1 conv (4)
M_SPLIT = H_IN // CB                 # row-phase count of the torch reshape (3)
SEG = W_IN * CB                      # column width of a reshaped image row (12)
HWIN = H_IN * W_IN                   # flattened input spatial (36)
HBIG = H_IN * RB                     # reshaped image height (12)
PATCH_DIM = 3 * PATCH * PATCH        # flattened patch length (192)


# ----------------------------- in-kernel helpers -----------------------------
def _layernorm(x, g, b):
    """f32 LayerNorm over the last dim; g/b broadcast as (1, D)."""
    mu = jnp.mean(x, axis=-1, keepdims=True)
    xc = x - mu
    var = jnp.mean(xc * xc, axis=-1, keepdims=True)
    return xc * jax.lax.rsqrt(var + LN_EPS) * g + b


def _gelu_tanh(x):
    # TODO(synk): tanh-approximate GELU (EUP tanh); torch nn.GELU() default is exact erf (~1e-3 diff).
    return 0.5 * x * (1.0 + jnp.tanh(_SQRT_2_OVER_PI * (x + 0.044715 * x * x * x)))


# ----------------------------- Pallas kernels -----------------------------
def _spatial_embed_kernel(x_ref, cw_ref, cb_ref, whm_ref, ww_ref, o_ref):
    """Fused SpatialConcatenation: 1x1 conv -> (3, HBIG, SEG) reshape -> bilinear to (3, S, S).

    The torch reshape (12,6,6)->(3,12,12) is a flat reinterpretation:
        img_g[k*M_SPLIT + m, Q] = y[GROUP*g + k, SEG*m + Q]
    so the row-interpolation  Wh @ img_g  becomes  sum_m Wh_m @ (W_g @ X_m + b_g)  with
    Wh_m = Wh[:, m::M_SPLIT]  (precomputed on the host) and  X_m = x_flat[:, SEG*m : SEG*(m+1)].
    Everything stays 2-D: no in-kernel reshape/transpose, intermediates never leave VMEM.
    """
    x = x_ref[0]                                              # (C_SPEC, HWIN) f32
    for g in range(3):                                        # static unroll over RGB groups
        wg = cw_ref[GROUP * g:GROUP * (g + 1), :]             # (GROUP, C_SPEC)
        bg = cb_ref[GROUP * g:GROUP * (g + 1), :]             # (GROUP, 1)
        t = jnp.zeros((S, SEG), jnp.float32)                  # (S, SEG) row-interp accumulator
        for m in range(M_SPLIT):
            xm = x[:, SEG * m:SEG * (m + 1)]                  # (C_SPEC, SEG)
            am = jnp.dot(wg, xm, preferred_element_type=jnp.float32) + bg      # (GROUP, SEG)
            t = t + jnp.dot(whm_ref[m], am, preferred_element_type=jnp.float32)  # (S, SEG)
        # column interpolation: resized_g = t @ Ww^T  -> (S, S)
        o_ref[0, g] = jax.lax.dot_general(
            t, ww_ref[...], (((1,), (1,)), ((), ())), preferred_element_type=jnp.float32)


def _encoder_kernel(patches_ref, pw_ref, pb_ref, cls_ref, pos_ref,
                    ln1g_ref, ln1b_ref, qkvw_ref, qkvb_ref, ow_ref, ob_ref,
                    ln2g_ref, ln2b_ref, w1_ref, b1_ref, w2_ref, b2_ref,
                    o_ref):
    """Whole ViT encoder.  grid = (batch, layer); the layer axis is 'arbitrary' and the f32
    residual stream lives in the resident output block (index map ignores the layer axis), so
    activations never touch HBM between layers.  Layer l==0 also performs the patch-embed matmul
    plus cls-token / positional-embedding assembly (token rows >= TOKENS are zero-padded and the
    corresponding softmax keys are masked)."""
    l = pl.program_id(1)

    @pl.when(l == 0)
    def _():
        tok = jnp.dot(patches_ref[0].astype(jnp.bfloat16), pw_ref[...],
                      preferred_element_type=jnp.float32) + pb_ref[...]        # (N_PATCH, D)
        pad = jnp.zeros((T_PAD - TOKENS, D), jnp.float32)
        o_ref[0] = jnp.concatenate([cls_ref[...], tok, pad], axis=0) + pos_ref[...]

    x = o_ref[0]                                              # (T_PAD, D) f32 residual stream

    # ---------------- attention sub-block: LN -> fused QKV -> per-head SDPA -> out proj ----------
    h = _layernorm(x, ln1g_ref[0], ln1b_ref[0])
    # ONE lane-dense (T, D) @ (D, 3D) matmul for Q, K and V of all heads.
    qkv = jnp.dot(h.astype(jnp.bfloat16), qkvw_ref[0],
                  preferred_element_type=jnp.float32) + qkvb_ref[0]            # (T_PAD, 3D)
    scale = 1.0 / math.sqrt(HEAD_DIM)
    key_mask = jax.lax.broadcasted_iota(jnp.int32, (T_PAD, T_PAD), 1) >= TOKENS

    ctx_parts = []
    for hh in range(NUM_HEADS):                               # static unroll over heads
        c0 = hh * HEAD_DIM
        q = qkv[:, c0:c0 + HEAD_DIM] * scale
        k = qkv[:, D + c0:D + c0 + HEAD_DIM]
        v = qkv[:, 2 * D + c0:2 * D + c0 + HEAD_DIM]
        s = jax.lax.dot_general(q.astype(jnp.bfloat16), k.astype(jnp.bfloat16),
                                (((1,), (1,)), ((), ())),
                                preferred_element_type=jnp.float32)            # (T_PAD, T_PAD)
        s = jnp.where(key_mask, jnp.float32(NEG_INF), s)      # ignore padded key rows
        m = jnp.max(s, axis=-1, keepdims=True)
        e = jnp.exp(s - m)
        p = e * pl.reciprocal(jnp.sum(e, axis=-1, keepdims=True), approx=True)
        ctx_parts.append(jnp.dot(p.astype(jnp.bfloat16), v.astype(jnp.bfloat16),
                                 preferred_element_type=jnp.float32))          # (T_PAD, HEAD_DIM)
    ctx = jnp.concatenate(ctx_parts, axis=1)                  # (T_PAD, D) lane-dense
    # ONE full-width out-projection on the concatenated context.
    attn = jnp.dot(ctx.astype(jnp.bfloat16), ow_ref[0],
                   preferred_element_type=jnp.float32) + ob_ref[0]
    r1 = x + attn                                             # residual #1 (stays in VMEM)

    # ---------------- MLP sub-block: LN -> fc1 -> GELU -> fc2 -> +residual -----------------------
    h2 = _layernorm(r1, ln2g_ref[0], ln2b_ref[0])
    ff = jnp.dot(h2.astype(jnp.bfloat16), w1_ref[0],
                 preferred_element_type=jnp.float32) + b1_ref[0]
    ff = _gelu_tanh(ff)
    ff = jnp.dot(ff.astype(jnp.bfloat16), w2_ref[0],
                 preferred_element_type=jnp.float32) + b2_ref[0]
    o_ref[0] = r1 + ff                                        # residual #2, resident across layers


# ----------------------------- kernel wrappers -----------------------------
def spatial_embed(x_flat, conv_w, conv_b, whm, ww):
    Bn = x_flat.shape[0]
    return pl.pallas_call(
        _spatial_embed_kernel,
        out_shape=jax.ShapeDtypeStruct((Bn, 3, S, S), jnp.float32),
        grid=(Bn,),
        in_specs=[
            pl.BlockSpec((1, C_SPEC, HWIN), lambda b: (b, 0, 0)),
            pl.BlockSpec((3 * GROUP, C_SPEC), lambda b: (0, 0)),
            pl.BlockSpec((3 * GROUP, 1), lambda b: (0, 0)),
            pl.BlockSpec((M_SPLIT, S, GROUP), lambda b: (0, 0, 0)),
            pl.BlockSpec((S, SEG), lambda b: (0, 0)),
        ],
        out_specs=pl.BlockSpec((1, 3, S, S), lambda b: (b, 0, 0, 0)),
        compiler_params=pltpu.CompilerParams(dimension_semantics=("parallel",)),
    )(x_flat, conv_w, conv_b, whm, ww)


def encoder_forward(patches, params):
    Bn = patches.shape[0]
    lw = params["layers"]

    def const_spec(shape):            # shared across (batch, layer)
        return pl.BlockSpec(shape, lambda b, l: (0,) * len(shape))

    def layer_spec(shape):            # layer-stacked weights, selected by the layer grid axis
        return pl.BlockSpec((1,) + shape[1:], lambda b, l: (l,) + (0,) * (len(shape) - 1))

    return pl.pallas_call(
        _encoder_kernel,
        out_shape=jax.ShapeDtypeStruct((Bn, T_PAD, D), jnp.float32),
        grid=(Bn, NUM_LAYERS),
        in_specs=[
            pl.BlockSpec((1, N_PATCH, PATCH_DIM), lambda b, l: (b, 0, 0)),
            const_spec((PATCH_DIM, D)),
            const_spec((1, D)),                      # patch bias
            const_spec((1, D)),                      # cls token
            const_spec((T_PAD, D)),                  # padded positional embedding
            layer_spec(lw["ln1_g"].shape),
            layer_spec(lw["ln1_b"].shape),
            layer_spec(lw["qkv_w"].shape),
            layer_spec(lw["qkv_b"].shape),
            layer_spec(lw["out_w"].shape),
            layer_spec(lw["out_b"].shape),
            layer_spec(lw["ln2_g"].shape),
            layer_spec(lw["ln2_b"].shape),
            layer_spec(lw["fc1_w"].shape),
            layer_spec(lw["fc1_b"].shape),
            layer_spec(lw["fc2_w"].shape),
            layer_spec(lw["fc2_b"].shape),
        ],
        out_specs=pl.BlockSpec((1, T_PAD, D), lambda b, l: (b, 0, 0)),
        compiler_params=pltpu.CompilerParams(
            dimension_semantics=("parallel", "arbitrary")),
    )(patches, params["patch_w"], params["patch_b"], params["cls_token"], params["pos_emb"],
      lw["ln1_g"], lw["ln1_b"], lw["qkv_w"], lw["qkv_b"], lw["out_w"], lw["out_b"],
      lw["ln2_g"], lw["ln2_b"], lw["fc1_w"], lw["fc1_b"], lw["fc2_w"], lw["fc2_b"])


# ----------------------------- setup helpers -----------------------------
def bilinear_matrix(in_size, out_size):
    """Row-interpolation matrix matching F.interpolate(mode='bilinear', align_corners=False)."""
    i = jnp.arange(out_size, dtype=jnp.float32)
    src = (i + 0.5) * (in_size / out_size) - 0.5
    src = jnp.maximum(src, 0.0)                       # PyTorch clamps negative source coords to 0
    i0 = jnp.minimum(jnp.floor(src).astype(jnp.int32), in_size - 1)
    i1 = jnp.minimum(i0 + 1, in_size - 1)
    w1 = src - i0.astype(jnp.float32)
    w0 = 1.0 - w1
    M = jnp.zeros((out_size, in_size), jnp.float32)
    rows = jnp.arange(out_size)
    M = M.at[rows, i0].add(w0)
    M = M.at[rows, i1].add(w1)
    return M


def init_params(key):
    ks = jax.random.split(key, 12)

    def dense(k, shape, dtype=jnp.float32):
        return (jax.random.normal(k, shape, jnp.float32) * 0.02).astype(dtype)

    wh = bilinear_matrix(HBIG, S)                                     # (S, HBIG)
    ww = bilinear_matrix(SEG, S)                                      # (S, SEG)
    # Pre-split Wh by row-phase m so the kernel never needs the torch reshape:
    # whm[m, :, k] = Wh[:, k*M_SPLIT + m]
    whm = jnp.stack([wh[:, m::M_SPLIT] for m in range(M_SPLIT)], axis=0)   # (M_SPLIT, S, GROUP)

    pos = dense(ks[4], (TOKENS, D))
    pos_pad = jnp.zeros((T_PAD, D), jnp.float32).at[:TOKENS].set(pos)  # padded rows stay zero

    params = {
        # SpatialConcatenation.convert_channels: Conv2d 1x1 weight stored as (Cout, Cin).
        "conv1x1_w": dense(ks[0], (3 * GROUP, C_SPEC)),
        "conv1x1_b": dense(ks[1], (3 * GROUP, 1)),
        "whm": whm,
        "ww": ww,
        # ViT: patch embedding + cls + pos + final LN + head.  Matmul weights in bf16 (MXU inputs).
        "patch_w": dense(ks[2], (PATCH_DIM, D), jnp.bfloat16),
        "patch_b": dense(ks[3], (1, D)),
        "cls_token": jnp.zeros((1, D), jnp.float32),
        "pos_emb": pos_pad,
        "ln_f_g": jnp.ones((1, D), jnp.float32),
        "ln_f_b": jnp.zeros((1, D), jnp.float32),
        "head_w": dense(ks[5], (D, NUM_CLASSES)),
        "head_b": jnp.zeros((1, NUM_CLASSES), jnp.float32),
    }
    kk = jax.random.split(ks[6], 4)
    params["layers"] = {
        "ln1_g": jnp.ones((NUM_LAYERS, 1, D), jnp.float32),
        "ln1_b": jnp.zeros((NUM_LAYERS, 1, D), jnp.float32),
        "qkv_w": dense(kk[0], (NUM_LAYERS, D, 3 * D), jnp.bfloat16),
        "qkv_b": jnp.zeros((NUM_LAYERS, 1, 3 * D), jnp.float32),
        "out_w": dense(kk[1], (NUM_LAYERS, D, D), jnp.bfloat16),
        "out_b": jnp.zeros((NUM_LAYERS, 1, D), jnp.float32),
        "ln2_g": jnp.ones((NUM_LAYERS, 1, D), jnp.float32),
        "ln2_b": jnp.zeros((NUM_LAYERS, 1, D), jnp.float32),
        "fc1_w": dense(kk[2], (NUM_LAYERS, D, MLP), jnp.bfloat16),
        "fc1_b": jnp.zeros((NUM_LAYERS, 1, MLP), jnp.float32),
        "fc2_w": dense(kk[3], (NUM_LAYERS, MLP, D), jnp.bfloat16),
        "fc2_b": jnp.zeros((NUM_LAYERS, 1, D), jnp.float32),
    }
    return params


# ----------------------------- model forward -----------------------------
@jax.jit
def spectral_vit_forward(x, params):
    """x: (B, C_SPEC, H_IN, W_IN) NCHW float32 -> logits (B, NUM_CLASSES)."""
    Bn = x.shape[0]

    # ---- SpatialConcatenation (1x1 conv + block reshape + bilinear) : one fused kernel ----
    x_flat = x.reshape(Bn, C_SPEC, HWIN)
    img = spatial_embed(x_flat, params["conv1x1_w"], params["conv1x1_b"],
                        params["whm"], params["ww"])                     # (B, 3, S, S)

    # ---- patchify (tiny host-side layout op; matches conv_proj's (C,P,P) row-major flatten) ----
    nh = nw = S // PATCH
    patches = (img.reshape(Bn, 3, nh, PATCH, nw, PATCH)
                  .transpose(0, 2, 4, 1, 3, 5)
                  .reshape(Bn, nh * nw, PATCH_DIM))                      # (B, N_PATCH, 3*P*P)

    # ---- whole transformer encoder (patch embed + cls + pos folded into layer 0) : one kernel ----
    tok = encoder_forward(patches, params)                               # (B, T_PAD, D)

    # ---- final LN + classifier head on the class token (tiny (B,1) output -> plain XLA) ----
    cls_tok = tok[:, 0, :]                                               # (B, D)
    cn = _layernorm(cls_tok, params["ln_f_g"], params["ln_f_b"])
    return cn @ params["head_w"] + params["head_b"]                      # (B, NUM_CLASSES)


# ----------------------------- main -----------------------------
if __name__ == "__main__":
    key = jax.random.PRNGKey(0)
    pkey, xkey = jax.random.split(key)
    params = init_params(pkey)
    x = jax.random.normal(xkey, (B, C_SPEC, H_IN, W_IN), jnp.float32)

    out = spectral_vit_forward(x, params)
    out = jax.block_until_ready(out)
    assert out.shape == (B, NUM_CLASSES), out.shape
    assert bool(jnp.all(jnp.isfinite(out)))
    print("KERNEL_OK")
</pallas_src>

<mosaic_0001>
module attributes {stable_mosaic.version = 11 : i64} {
  func.func @_spatial_embed_kernel(%arg0: i32, %arg1: memref<1x8x36xf32, #tpu.memory_space<vmem>>, %arg2: memref<12x8xf32, #tpu.memory_space<vmem>>, %arg3: memref<12x1xf32, #tpu.memory_space<vmem>>, %arg4: memref<3x16x4xf32, #tpu.memory_space<vmem>>, %arg5: memref<16x12xf32, #tpu.memory_space<vmem>>, %arg6: memref<1x3x16x16xf32, #tpu.memory_space<vmem>>) attributes {dimension_semantics = [#tpu.dimension_semantics<parallel>], iteration_bounds = array<i64: 2>, scalar_prefetch = 0 : i64, scratch_operands = 0 : i64, tpu.core_type = #tpu.core_type<tc>, window_params = [{transform_indices = @transform_0, window_bounds = array<i64: 1, 8, 36>}, {pipeline_mode = #tpu.pipeline_mode<synchronous>, transform_indices = @transform_1, window_bounds = array<i64: 12, 8>}, {pipeline_mode = #tpu.pipeline_mode<synchronous>, transform_indices = @transform_2, window_bounds = array<i64: 12, 1>}, {pipeline_mode = #tpu.pipeline_mode<synchronous>, transform_indices = @transform_3, window_bounds = array<i64: 3, 16, 4>}, {pipeline_mode = #tpu.pipeline_mode<synchronous>, transform_indices = @transform_4, window_bounds = array<i64: 16, 12>}, {transform_indices = @transform_5, window_bounds = array<i64: 1, 3, 16, 16>}]} {
    %c0 = arith.constant 0 : index
    %c0_0 = arith.constant 0 : index
    %c0_1 = arith.constant 0 : index
    %0 = vector.load %arg1[%c0, %c0_0, %c0_1] : memref<1x8x36xf32, #tpu.memory_space<vmem>>, vector<1x8x36xf32>
    %1 = vector.shape_cast %0 : vector<1x8x36xf32> to vector<8x36xf32>
    %c0_2 = arith.constant 0 : index
    %c0_3 = arith.constant 0 : index
    %2 = vector.load %arg2[%c0_2, %c0_3] : memref<12x8xf32, #tpu.memory_space<vmem>>, vector<4x8xf32>
    %c0_4 = arith.constant 0 : index
    %c0_5 = arith.constant 0 : index
    %3 = vector.load %arg3[%c0_4, %c0_5] : memref<12x1xf32, #tpu.memory_space<vmem>>, vector<4x1xf32>
    %cst = arith.constant 0.000000e+00 : f32
    %4 = vector.broadcast %cst : f32 to vector<16x12xf32>
    %5 = vector.extract_strided_slice %1 {offsets = [0, 0], sizes = [8, 12], strides = [1, 1]} : vector<8x36xf32> to vector<8x12xf32>
    %cst_6 = arith.constant dense<0.000000e+00> : vector<4x12xf32>
    %6 = tpu.matmul %2, %5, %cst_6 {dimension_numbers = #tpu.dot_dimension_numbers<[1], [0], [0], [1], [0, 0, 1, 1], [], []>} : vector<4x8xf32>, vector<8x12xf32>, vector<4x12xf32> -> vector<4x12xf32>
    %7 = vector.broadcast %3 : vector<4x1xf32> to vector<4x12xf32>
    %8 = arith.addf %6, %7 : vector<4x12xf32>
    %c0_7 = arith.constant 0 : index
    %c0_8 = arith.constant 0 : index
    %c0_9 = arith.constant 0 : index
    %9 = vector.load %arg4[%c0_7, %c0_8, %c0_9] : memref<3x16x4xf32, #tpu.memory_space<vmem>>, vector<1x16x4xf32>
    %10 = vector.shape_cast %9 : vector<1x16x4xf32> to vector<16x4xf32>
    %cst_10 = arith.constant dense<0.000000e+00> : vector<16x12xf32>
    %11 = tpu.matmul %10, %8, %cst_10 {dimension_numbers = #tpu.dot_dimension_numbers<[1], [0], [0], [1], [0, 0, 1, 1], [], []>} : vector<16x4xf32>, vector<4x12xf32>, vector<16x12xf32> -> vector<16x12xf32>
    %12 = arith.addf %4, %11 : vector<16x12xf32>
    %13 = vector.extract_strided_slice %1 {offsets = [0, 12], sizes = [8, 12], strides = [1, 1]} : vector<8x36xf32> to vector<8x12xf32>
    %cst_11 = arith.constant dense<0.000000e+00> : vector<4x12xf32>
    %14 = tpu.matmul %2, %13, %cst_11 {dimension_numbers = #tpu.dot_dimension_numbers<[1], [0], [0], [1], [0, 0, 1, 1], [], []>} : vector<4x8xf32>, vector<8x12xf32>, vector<4x12xf32> -> vector<4x12xf32>
    %15 = vector.broadcast %3 : vector<4x1xf32> to vector<4x12xf32>
    %16 = arith.addf %14, %15 : vector<4x12xf32>
    %c1 = arith.constant 1 : index
    %c0_12 = arith.constant 0 : index
    %c0_13 = arith.constant 0 : index
    %17 = vector.load %arg4[%c1, %c0_12, %c0_13] : memref<3x16x4xf32, #tpu.memory_space<vmem>>, vector<1x16x4xf32>
    %18 = vector.shape_cast %17 : vector<1x16x4xf32> to vector<16x4xf32>
    %cst_14 = arith.constant dense<0.000000e+00> : vector<16x12xf32>
    %19 = tpu.matmul %18, %16, %cst_14 {dimension_numbers = #tpu.dot_dimension_numbers<[1], [0], [0], [1], [0, 0, 1, 1], [], []>} : vector<16x4xf32>, vector<4x12xf32>, vector<16x12xf32> -> vector<16x12xf32>
    %20 = arith.addf %12, %19 : vector<16x12xf32>
    %21 = vector.extract_strided_slice %1 {offsets = [0, 24], sizes = [8, 12], strides = [1, 1]} : vector<8x36xf32> to vector<8x12xf32>
    %cst_15 = arith.constant dense<0.000000e+00> : vector<4x12xf32>
    %22 = tpu.matmul %2, %21, %cst_15 {dimension_numbers = #tpu.dot_dimension_numbers<[1], [0], [0], [1], [0, 0, 1, 1], [], []>} : vector<4x8xf32>, vector<8x12xf32>, vector<4x12xf32> -> vector<4x12xf32>
    %23 = vector.broadcast %3 : vector<4x1xf32> to vector<4x12xf32>
    %24 = arith.addf %22, %23 : vector<4x12xf32>
    %c2 = arith.constant 2 : index
    %c0_16 = arith.constant 0 : index
    %c0_17 = arith.constant 0 : index
    %25 = vector.load %arg4[%c2, %c0_16, %c0_17] : memref<3x16x4xf32, #tpu.memory_space<vmem>>, vector<1x16x4xf32>
    %26 = vector.shape_cast %25 : vector<1x16x4xf32> to vector<16x4xf32>
    %cst_18 = arith.constant dense<0.000000e+00> : vector<16x12xf32>
    %27 = tpu.matmul %26, %24, %cst_18 {dimension_numbers = #tpu.dot_dimension_numbers<[1], [0], [0], [1], [0, 0, 1, 1], [], []>} : vector<16x4xf32>, vector<4x12xf32>, vector<16x12xf32> -> vector<16x12xf32>
    %28 = arith.addf %20, %27 : vector<16x12xf32>
    %c0_19 = arith.constant 0 : index
    %c0_20 = arith.constant 0 : index
    %29 = vector.load %arg5[%c0_19, %c0_20] : memref<16x12xf32, #tpu.memory_space<vmem>>, vector<16x12xf32>
    %cst_21 = arith.constant dense<0.000000e+00> : vector<16x16xf32>
    %30 = tpu.matmul %28, %29, %cst_21 {dimension_numbers = #tpu.dot_dimension_numbers<[1], [1], [0], [0], [0, 0, 1, 0], [], []>} : vector<16x12xf32>, vector<16x12xf32>, vector<16x16xf32> -> vector<16x16xf32>
    %c0_22 = arith.constant 0 : index
    %c0_23 = arith.constant 0 : index
    %c0_24 = arith.constant 0 : index
    %c0_25 = arith.constant 0 : index
    %31 = vector.load %arg6[%c0_22, %c0_23, %c0_24, %c0_25] : memref<1x3x16x16xf32, #tpu.memory_space<vmem>>, vector<1x1x16x16xf32>
    %32 = vector.shape_cast %31 : vector<1x1x16x16xf32> to vector<16x16xf32>
    %33 = vector.shape_cast %30 : vector<16x16xf32> to vector<1x1x16x16xf32>
    tpu.vector_store %arg6[%c0_22, %c0_23, %c0_24, %c0_25], %33 {strides = array<i32>} : memref<1x3x16x16xf32, #tpu.memory_space<vmem>>, vector<1x1x16x16xf32>,
    %c4 = arith.constant 4 : index
    %c0_26 = arith.constant 0 : index
    %34 = vector.load %arg2[%c4, %c0_26] : memref<12x8xf32, #tpu.memory_space<vmem>>, vector<4x8xf32>
    %c4_27 = arith.constant 4 : index
    %c0_28 = arith.constant 0 : index
    %35 = vector.load %arg3[%c4_27, %c0_28] : memref<12x1xf32, #tpu.memory_space<vmem>>, vector<4x1xf32>
    %cst_29 = arith.constant 0.000000e+00 : f32
    %36 = vector.broadcast %cst_29 : f32 to vector<16x12xf32>
    %37 = vector.extract_strided_slice %1 {offsets = [0, 0], sizes = [8, 12], strides = [1, 1]} : vector<8x36xf32> to vector<8x12xf32>
    %cst_30 = arith.constant dense<0.000000e+00> : vector<4x12xf32>
    %38 = tpu.matmul %34, %37, %cst_30 {dimension_numbers = #tpu.dot_dimension_numbers<[1], [0], [0], [1], [0, 0, 1, 1], [], []>} : vector<4x8xf32>, vector<8x12xf32>, vector<4x12xf32> -> vector<4x12xf32>
    %39 = vector.broadcast %35 : vector<4x1xf32> to vector<4x12xf32>
    %40 = arith.addf %38, %39 : vector<4x12xf32>
    %c0_31 = arith.constant 0 : index
    %c0_32 = arith.constant 0 : index
    %c0_33 = arith.constant 0 : index
    %41 = vector.load %arg4[%c0_31, %c0_32, %c0_33] : memref<3x16x4xf32, #tpu.memory_space<vmem>>, vector<1x16x4xf32>
    %42 = vector.shape_cast %41 : vector<1x16x4xf32> to vector<16x4xf32>
    %cst_34 = arith.constant dense<0.000000e+00> : vector<16x12xf32>
    %43 = tpu.matmul %42, %40, %cst_34 {dimension_numbers = #tpu.dot_dimension_numbers<[1], [0], [0], [1], [0, 0, 1, 1], [], []>} : vector<16x4xf32>, vector<4x12xf32>, vector<16x12xf32> -> vector<16x12xf32>
    %44 = arith.addf %36, %43 : vector<16x12xf32>
    %45 = vector.extract_strided_slice %1 {offsets = [0, 12], sizes = [8, 12], strides = [1, 1]} : vector<8x36xf32> to vector<8x12xf32>
    %cst_35 = arith.constant dense<0.000000e+00> : vector<4x12xf32>
    %46 = tpu.matmul %34, %45, %cst_35 {dimension_numbers = #tpu.dot_dimension_numbers<[1], [0], [0], [1], [0, 0, 1, 1], [], []>} : vector<4x8xf32>, vector<8x12xf32>, vector<4x12xf32> -> vector<4x12xf32>
    %47 = vector.broadcast %35 : vector<4x1xf32> to vector<4x12xf32>
    %48 = arith.addf %46, %47 : vector<4x12xf32>
    %c1_36 = arith.constant 1 : index
    %c0_37 = arith.constant 0 : index
    %c0_38 = arith.constant 0 : index
    %49 = vector.load %arg4[%c1_36, %c0_37, %c0_38] : memref<3x16x4xf32, #tpu.memory_space<vmem>>, vector<1x16x4xf32>
    %50 = vector.shape_cast %49 : vector<1x16x4xf32> to vector<16x4xf32>
    %cst_39 = arith.constant dense<0.000000e+00> : vector<16x12xf32>
    %51 = tpu.matmul %50, %48, %cst_39 {dimension_numbers = #tpu.dot_dimension_numbers<[1], [0], [0], [1], [0, 0, 1, 1], [], []>} : vector<16x4xf32>, vector<4x12xf32>, vector<16x12xf32> -> vector<16x12xf32>
    %52 = arith.addf %44, %51 : vector<16x12xf32>
    %53 = vector.extract_strided_slice %1 {offsets = [0, 24], sizes = [8, 12], strides = [1, 1]} : vector<8x36xf32> to vector<8x12xf32>
    %cst_40 = arith.constant dense<0.000000e+00> : vector<4x12xf32>
    %54 = tpu.matmul %34, %53, %cst_40 {dimension_numbers = #tpu.dot_dimension_numbers<[1], [0], [0], [1], [0, 0, 1, 1], [], []>} : vector<4x8xf32>, vector<8x12xf32>, vector<4x12xf32> -> vector<4x12xf32>
    %55 = vector.broadcast %35 : vector<4x1xf32> to vector<4x12xf32>
    %56 = arith.addf %54, %55 : vector<4x12xf32>
    %c2_41 = arith.constant 2 : index
    %c0_42 = arith.constant 0 : index
    %c0_43 = arith.constant 0 : index
    %57 = vector.load %arg4[%c2_41, %c0_42, %c0_43] : memref<3x16x4xf32, #tpu.memory_space<vmem>>, vector<1x16x4xf32>
    %58 = vector.shape_cast %57 : vector<1x16x4xf32> to vector<16x4xf32>
    %cst_44 = arith.constant dense<0.000000e+00> : vector<16x12xf32>
    %59 = tpu.matmul %58, %56, %cst_44 {dimension_numbers = #tpu.dot_dimension_numbers<[1], [0], [0], [1], [0, 0, 1, 1], [], []>} : vector<16x4xf32>, vector<4x12xf32>, vector<16x12xf32> -> vector<16x12xf32>
    %60 = arith.addf %52, %59 : vector<16x12xf32>
    %c0_45 = arith.constant 0 : index
    %c0_46 = arith.constant 0 : index
    %61 = vector.load %arg5[%c0_45, %c0_46] : memref<16x12xf32, #tpu.memory_space<vmem>>, vector<16x12xf32>
    %cst_47 = arith.constant dense<0.000000e+00> : vector<16x16xf32>
    %62 = tpu.matmul %60, %61, %cst_47 {dimension_numbers = #tpu.dot_dimension_numbers<[1], [1], [0], [0], [0, 0, 1, 0], [], []>} : vector<16x12xf32>, vector<16x12xf32>, vector<16x16xf32> -> vector<16x16xf32>
    %c0_48 = arith.constant 0 : index
    %c1_49 = arith.constant 1 : index
    %c0_50 = arith.constant 0 : index
    %c0_51 = arith.constant 0 : index
    %63 = vector.load %arg6[%c0_48, %c1_49, %c0_50, %c0_51] : memref<1x3x16x16xf32, #tpu.memory_space<vmem>>, vector<1x1x16x16xf32>
    %64 = vector.shape_cast %63 : vector<1x1x16x16xf32> to vector<16x16xf32>
    %65 = vector.shape_cast %62 : vector<16x16xf32> to vector<1x1x16x16xf32>
    tpu.vector_store %arg6[%c0_48, %c1_49, %c0_50, %c0_51], %65 {strides = array<i32>} : memref<1x3x16x16xf32, #tpu.memory_space<vmem>>, vector<1x1x16x16xf32>,
    %c8 = arith.constant 8 : index
    %c0_52 = arith.constant 0 : index
    %66 = vector.load %arg2[%c8, %c0_52] : memref<12x8xf32, #tpu.memory_space<vmem>>, vector<4x8xf32>
    %c8_53 = arith.constant 8 : index
    %c0_54 = arith.constant 0 : index
    %67 = vector.load %arg3[%c8_53, %c0_54] : memref<12x1xf32, #tpu.memory_space<vmem>>, vector<4x1xf32>
    %cst_55 = arith.constant 0.000000e+00 : f32
    %68 = vector.broadcast %cst_55 : f32 to vector<16x12xf32>
    %69 = vector.extract_strided_slice %1 {offsets = [0, 0], sizes = [8, 12], strides = [1, 1]} : vector<8x36xf32> to vector<8x12xf32>
    %cst_56 = arith.constant dense<0.000000e+00> : vector<4x12xf32>
    %70 = tpu.matmul %66, %69, %cst_56 {dimension_numbers = #tpu.dot_dimension_numbers<[1], [0], [0], [1], [0, 0, 1, 1], [], []>} : vector<4x8xf32>, vector<8x12xf32>, vector<4x12xf32> -> vector<4x12xf32>
    %71 = vector.broadcast %67 : vector<4x1xf32> to vector<4x12xf32>
    %72 = arith.addf %70, %71 : vector<4x12xf32>
    %c0_57 = arith.constant 0 : index
    %c0_58 = arith.constant 0 : index
    %c0_59 = arith.constant 0 : index
    %73 = vector.load %arg4[%c0_57, %c0_58, %c0_59] : memref<3x16x4xf32, #tpu.memory_space<vmem>>, vector<1x16x4xf32>
    %74 = vector.shape_cast %73 : vector<1x16x4xf32> to vector<16x4xf32>
    %cst_60 = arith.constant dense<0.000000e+00> : vector<16x12xf32>
    %75 = tpu.matmul %74, %72, %cst_60 {dimension_numbers = #tpu.dot_dimension_numbers<[1], [0], [0], [1], [0, 0, 1, 1], [], []>} : vector<16x4xf32>, vector<4x12xf32>, vector<16x12xf32> -> vector<16x12xf32>
    %76 = arith.addf %68, %75 : vector<16x12xf32>
    %77 = vector.extract_strided_slice %1 {offsets = [0, 12], sizes = [8, 12], strides = [1, 1]} : vector<8x36xf32> to vector<8x12xf32>
    %cst_61 = arith.constant dense<0.000000e+00> : vector<4x12xf32>
    %78 = tpu.matmul %66, %77, %cst_61 {dimension_numbers = #tpu.dot_dimension_numbers<[1], [0], [0], [1], [0, 0, 1, 1], [], []>} : vector<4x8xf32>, vector<8x12xf32>, vector<4x12xf32> -> vector<4x12xf32>
    %79 = vector.broadcast %67 : vector<4x1xf32> to vector<4x12xf32>
    %80 = arith.addf %78, %79 : vector<4x12xf32>
    %c1_62 = arith.constant 1 : index
    %c0_63 = arith.constant 0 : index
    %c0_64 = arith.constant 0 : index
    %81 = vector.load %arg4[%c1_62, %c0_63, %c0_64] : memref<3x16x4xf32, #tpu.memory_space<vmem>>, vector<1x16x4xf32>
    %82 = vector.shape_cast %81 : vector<1x16x4xf32> to vector<16x4xf32>
    %cst_65 = arith.constant dense<0.000000e+00> : vector<16x12xf32>
    %83 = tpu.matmul %82, %80, %cst_65 {dimension_numbers = #tpu.dot_dimension_numbers<[1], [0], [0], [1], [0, 0, 1, 1], [], []>} : vector<16x4xf32>, vector<4x12xf32>, vector<16x12xf32> -> vector<16x12xf32>
    %84 = arith.addf %76, %83 : vector<16x12xf32>
    %85 = vector.extract_strided_slice %1 {offsets = [0, 24], sizes = [8, 12], strides = [1, 1]} : vector<8x36xf32> to vector<8x12xf32>
    %cst_66 = arith.constant dense<0.000000e+00> : vector<4x12xf32>
    %86 = tpu.matmul %66, %85, %cst_66 {dimension_numbers = #tpu.dot_dimension_numbers<[1], [0], [0], [1], [0, 0, 1, 1], [], []>} : vector<4x8xf32>, vector<8x12xf32>, vector<4x12xf32> -> vector<4x12xf32>
    %87 = vector.broadcast %67 : vector<4x1xf32> to vector<4x12xf32>
    %88 = arith.addf %86, %87 : vector<4x12xf32>
    %c2_67 = arith.constant 2 : index
    %c0_68 = arith.constant 0 : index
    %c0_69 = arith.constant 0 : index
    %89 = vector.load %arg4[%c2_67, %c0_68, %c0_69] : memref<3x16x4xf32, #tpu.memory_space<vmem>>, vector<1x16x4xf32>
    %90 = vector.shape_cast %89 : vector<1x16x4xf32> to vector<16x4xf32>
    %cst_70 = arith.constant dense<0.000000e+00> : vector<16x12xf32>
    %91 = tpu.matmul %90, %88, %cst_70 {dimension_numbers = #tpu.dot_dimension_numbers<[1], [0], [0], [1], [0, 0, 1, 1], [], []>} : vector<16x4xf32>, vector<4x12xf32>, vector<16x12xf32> -> vector<16x12xf32>
    %92 = arith.addf %84, %91 : vector<16x12xf32>
    %c0_71 = arith.constant 0 : index
    %c0_72 = arith.constant 0 : index
    %93 = vector.load %arg5[%c0_71, %c0_72] : memref<16x12xf32, #tpu.memory_space<vmem>>, vector<16x12xf32>
    %cst_73 = arith.constant dense<0.000000e+00> : vector<16x16xf32>
    %94 = tpu.matmul %92, %93, %cst_73 {dimension_numbers = #tpu.dot_dimension_numbers<[1], [1], [0], [0], [0, 0, 1, 0], [], []>} : vector<16x12xf32>, vector<16x12xf32>, vector<16x16xf32> -> vector<16x16xf32>
    %c0_74 = arith.constant 0 : index
    %c2_75 = arith.constant 2 : index
    %c0_76 = arith.constant 0 : index
    %c0_77 = arith.constant 0 : index
    %95 = vector.load %arg6[%c0_74, %c2_75, %c0_76, %c0_77] : memref<1x3x16x16xf32, #tpu.memory_space<vmem>>, vector<1x1x16x16xf32>
    %96 = vector.shape_cast %95 : vector<1x1x16x16xf32> to vector<16x16xf32>
    %97 = vector.shape_cast %94 : vector<16x16xf32> to vector<1x1x16x16xf32>
    tpu.vector_store %arg6[%c0_74, %c2_75, %c0_76, %c0_77], %97 {strides = array<i32>} : memref<1x3x16x16xf32, #tpu.memory_space<vmem>>, vector<1x1x16x16xf32>,
    return
  }
  func.func @transform_0(%arg0: i32) -> (i32, i32, i32) {
    %c0_i32 = arith.constant 0 : i32
    %c0_i32_0 = arith.constant 0 : i32
    %c0_i32_1 = arith.constant 0 : i32
    return %arg0, %c0_i32, %c0_i32_0 : i32, i32, i32
  }
  func.func @transform_1(%arg0: i32) -> (i32, i32) {
    %c0_i32 = arith.constant 0 : i32
    %c0_i32_0 = arith.constant 0 : i32
    %c0_i32_1 = arith.constant 0 : i32
    return %c0_i32, %c0_i32_0 : i32, i32
  }
  func.func @transform_2(%arg0: i32) -> (i32, i32) {
    %c0_i32 = arith.constant 0 : i32
    %c0_i32_0 = arith.constant 0 : i32
    %c0_i32_1 = arith.constant 0 : i32
    return %c0_i32, %c0_i32_0 : i32, i32
  }
  func.func @transform_3(%arg0: i32) -> (i32, i32, i32) {
    %c0_i32 = arith.constant 0 : i32
    %c0_i32_0 = arith.constant 0 : i32
    %c0_i32_1 = arith.constant 0 : i32
    %c0_i32_2 = arith.constant 0 : i32
    return %c0_i32, %c0_i32_0, %c0_i32_1 : i32, i32, i32
  }
  func.func @transform_4(%arg0: i32) -> (i32, i32) {
    %c0_i32 = arith.constant 0 : i32
    %c0_i32_0 = arith.constant 0 : i32
    %c0_i32_1 = arith.constant 0 : i32
    return %c0_i32, %c0_i32_0 : i32, i32
  }
  func.func @transform_5(%arg0: i32) -> (i32, i32, i32, i32) {
    %c0_i32 = arith.constant 0 : i32
    %c0_i32_0 = arith.constant 0 : i32
    %c0_i32_1 = arith.constant 0 : i32
    %c0_i32_2 = arith.constant 0 : i32
    return %arg0, %c0_i32, %c0_i32_0, %c0_i32_1 : i32, i32, i32, i32
  }
}

module attributes {stable_mosaic.version = 11 : i64} {
  func.func @_encoder_kernel(%arg0: i32, %arg1: i32, %arg2: memref<1x4x192xf32, #tpu.memory_space<vmem>>, %arg3: memref<192x128xbf16, #tpu.memory_space<vmem>>, %arg4: memref<1x128xf32, #tpu.memory_space<vmem>>, %arg5: memref<1x128xf32, #tpu.memory_space<vmem>>, %arg6: memref<8x128xf32, #tpu.memory_space<vmem>>, %arg7: memref<1x1x128xf32, #tpu.memory_space<vmem>>, %arg8: memref<1x1x128xf32, #tpu.memory_space<vmem>>, %arg9: memref<1x128x384xbf16, #tpu.memory_space<vmem>>, %arg10: memref<1x1x384xf32, #tpu.memory_space<vmem>>, %arg11: memref<1x128x128xbf16, #tpu.memory_space<vmem>>, %arg12: memref<1x1x128xf32, #tpu.memory_space<vmem>>, %arg13: memref<1x1x128xf32, #tpu.memory_space<vmem>>, %arg14: memref<1x1x128xf32, #tpu.memory_space<vmem>>, %arg15: memref<1x128x256xbf16, #tpu.memory_space<vmem>>, %arg16: memref<1x1x256xf32, #tpu.memory_space<vmem>>, %arg17: memref<1x256x128xbf16, #tpu.memory_space<vmem>>, %arg18: memref<1x1x128xf32, #tpu.memory_space<vmem>>, %arg19: memref<1x8x128xf32, #tpu.memory_space<vmem>>) attributes {dimension_semantics = [#tpu.dimension_semantics<parallel>, #tpu.dimension_semantics<arbitrary>], iteration_bounds = array<i64: 2, 2>, scalar_prefetch = 0 : i64, scratch_operands = 0 : i64, tpu.core_type = #tpu.core_type<tc>, window_params = [{transform_indices = @transform_0, window_bounds = array<i64: 1, 4, 192>}, {pipeline_mode = #tpu.pipeline_mode<synchronous>, transform_indices = @transform_1, window_bounds = array<i64: 192, 128>}, {pipeline_mode = #tpu.pipeline_mode<synchronous>, transform_indices = @transform_2, window_bounds = array<i64: 1, 128>}, {pipeline_mode = #tpu.pipeline_mode<synchronous>, transform_indices = @transform_3, window_bounds = array<i64: 1, 128>}, {pipeline_mode = #tpu.pipeline_mode<synchronous>, transform_indices = @transform_4, window_bounds = array<i64: 8, 128>}, {transform_indices = @transform_5, window_bounds = array<i64: 1, 1, 128>}, {transform_indices = @transform_6, window_bounds = array<i64: 1, 1, 128>}, {transform_indices = @transform_7, window_bounds = array<i64: 1, 128, 384>}, {transform_indices = @transform_8, window_bounds = array<i64: 1, 1, 384>}, {transform_indices = @transform_9, window_bounds = array<i64: 1, 128, 128>}, {transform_indices = @transform_10, window_bounds = array<i64: 1, 1, 128>}, {transform_indices = @transform_11, window_bounds = array<i64: 1, 1, 128>}, {transform_indices = @transform_12, window_bounds = array<i64: 1, 1, 128>}, {transform_indices = @transform_13, window_bounds = array<i64: 1, 128, 256>}, {transform_indices = @transform_14, window_bounds = array<i64: 1, 1, 256>}, {transform_indices = @transform_15, window_bounds = array<i64: 1, 256, 128>}, {transform_indices = @transform_16, window_bounds = array<i64: 1, 1, 128>}, {transform_indices = @transform_17, window_bounds = array<i64: 1, 8, 128>}]} {
    %c0_i32 = arith.constant 0 : i32
    %0 = arith.cmpi eq, %arg1, %c0_i32 : i32
    %1 = arith.extui %0 : i1 to i32
    %c0_i32_0 = arith.constant 0 : i32
    %2 = arith.cmpi ne, %1, %c0_i32_0 : i32
    scf.if %2 {
      %c0_83 = arith.constant 0 : index
      %c0_84 = arith.constant 0 : index
      %c0_85 = arith.constant 0 : index
      %199 = vector.load %arg2[%c0_83, %c0_84, %c0_85] : memref<1x4x192xf32, #tpu.memory_space<vmem>>, vector<1x4x192xf32>
      %200 = vector.shape_cast %199 : vector<1x4x192xf32> to vector<4x192xf32>
      %201 = arith.truncf %200 : vector<4x192xf32> to vector<4x192xbf16>
      %c0_86 = arith.constant 0 : index
      %c0_87 = arith.constant 0 : index
      %202 = vector.load %arg3[%c0_86, %c0_87] : memref<192x128xbf16, #tpu.memory_space<vmem>>, vector<192x128xbf16>
      %cst_88 = arith.constant dense<0.000000e+00> : vector<4x128xf32>
      %203 = tpu.matmul %201, %202, %cst_88 {dimension_numbers = #tpu.dot_dimension_numbers<[1], [0], [0], [1], [0, 0, 1, 1], [], []>} : vector<4x192xbf16>, vector<192x128xbf16>, vector<4x128xf32> -> vector<4x128xf32>
      %c0_89 = arith.constant 0 : index
      %c0_90 = arith.constant 0 : index
      %204 = vector.load %arg4[%c0_89, %c0_90] : memref<1x128xf32, #tpu.memory_space<vmem>>, vector<1x128xf32>
      %205 = vector.broadcast %204 : vector<1x128xf32> to vector<4x128xf32>
      %206 = arith.addf %203, %205 : vector<4x128xf32>
      %cst_91 = arith.constant 0.000000e+00 : f32
      %207 = vector.broadcast %cst_91 : f32 to vector<3x128xf32>
      %c0_92 = arith.constant 0 : index
      %c0_93 = arith.constant 0 : index
      %208 = vector.load %arg5[%c0_92, %c0_93] : memref<1x128xf32, #tpu.memory_space<vmem>>, vector<1x128xf32>
      %209 = tpu.concatenate %208, %206, %207 in 0 : vector<1x128xf32>, vector<4x128xf32>, vector<3x128xf32> -> vector<8x128xf32>
      %c0_94 = arith.constant 0 : index
      %c0_95 = arith.constant 0 : index
      %210 = vector.load %arg6[%c0_94, %c0_95] : memref<8x128xf32, #tpu.memory_space<vmem>>, vector<8x128xf32>
      %211 = arith.addf %209, %210 : vector<8x128xf32>
      %c0_96 = arith.constant 0 : index
      %c0_97 = arith.constant 0 : index
      %c0_98 = arith.constant 0 : index
      %212 = vector.load %arg19[%c0_96, %c0_97, %c0_98] : memref<1x8x128xf32, #tpu.memory_space<vmem>>, vector<1x8x128xf32>
      %213 = vector.shape_cast %212 : vector<1x8x128xf32> to vector<8x128xf32>
      %214 = vector.shape_cast %211 : vector<8x128xf32> to vector<1x8x128xf32>
      tpu.vector_store %arg19[%c0_96, %c0_97, %c0_98], %214 {strides = array<i32>} : memref<1x8x128xf32, #tpu.memory_space<vmem>>, vector<1x8x128xf32>,
    } else {
    }
    %c0 = arith.constant 0 : index
    %c0_1 = arith.constant 0 : index
    %c0_2 = arith.constant 0 : index
    %3 = vector.load %arg19[%c0, %c0_1, %c0_2] : memref<1x8x128xf32, #tpu.memory_space<vmem>>, vector<1x8x128xf32>
    %4 = vector.shape_cast %3 : vector<1x8x128xf32> to vector<8x128xf32>
    %c0_3 = arith.constant 0 : index
    %c0_4 = arith.constant 0 : index
    %c0_5 = arith.constant 0 : index
    %5 = vector.load %arg7[%c0_3, %c0_4, %c0_5] : memref<1x1x128xf32, #tpu.memory_space<vmem>>, vector<1x1x128xf32>
    %6 = vector.shape_cast %5 : vector<1x1x128xf32> to vector<1x128xf32>
    %c0_6 = arith.constant 0 : index
    %c0_7 = arith.constant 0 : index
    %c0_8 = arith.constant 0 : index
    %7 = vector.load %arg8[%c0_6, %c0_7, %c0_8] : memref<1x1x128xf32, #tpu.memory_space<vmem>>, vector<1x1x128xf32>
    %8 = vector.shape_cast %7 : vector<1x1x128xf32> to vector<1x128xf32>
    %cst = arith.constant dense<0.000000e+00> : vector<8xf32>
    %9 = vector.multi_reduction <add>, %4, %cst [1] : vector<8x128xf32> to vector<8xf32>
    %10 = vector.shape_cast %9 : vector<8xf32> to vector<8x1xf32>
    %cst_9 = arith.constant 1.280000e+02 : f32
    %11 = vector.broadcast %cst_9 : f32 to vector<8x1xf32>
    %12 = arith.divf %10, %11 : vector<8x1xf32>
    %13 = vector.broadcast %12 : vector<8x1xf32> to vector<8x128xf32>
    %14 = arith.subf %4, %13 : vector<8x128xf32>
    %15 = arith.mulf %14, %14 : vector<8x128xf32>
    %cst_10 = arith.constant dense<0.000000e+00> : vector<8xf32>
    %16 = vector.multi_reduction <add>, %15, %cst_10 [1] : vector<8x128xf32> to vector<8xf32>
    %17 = vector.shape_cast %16 : vector<8xf32> to vector<8x1xf32>
    %cst_11 = arith.constant 1.280000e+02 : f32
    %18 = vector.broadcast %cst_11 : f32 to vector<8x1xf32>
    %19 = arith.divf %17, %18 : vector<8x1xf32>
    %cst_12 = arith.constant 9.99999997E-7 : f32
    %20 = vector.broadcast %cst_12 : f32 to vector<8x1xf32>
    %21 = arith.addf %19, %20 : vector<8x1xf32>
    %22 = math.rsqrt %21 : vector<8x1xf32>
    %23 = vector.broadcast %22 : vector<8x1xf32> to vector<8x128xf32>
    %24 = arith.mulf %14, %23 : vector<8x128xf32>
    %25 = vector.broadcast %6 : vector<1x128xf32> to vector<8x128xf32>
    %26 = arith.mulf %24, %25 : vector<8x128xf32>
    %27 = vector.broadcast %8 : vector<1x128xf32> to vector<8x128xf32>
    %28 = arith.addf %26, %27 : vector<8x128xf32>
    %29 = arith.truncf %28 : vector<8x128xf32> to vector<8x128xbf16>
    %c0_13 = arith.constant 0 : index
    %c0_14 = arith.constant 0 : index
    %c0_15 = arith.constant 0 : index
    %30 = vector.load %arg9[%c0_13, %c0_14, %c0_15] : memref<1x128x384xbf16, #tpu.memory_space<vmem>>, vector<1x128x384xbf16>
    %31 = vector.shape_cast %30 : vector<1x128x384xbf16> to vector<128x384xbf16>
    %cst_16 = arith.constant dense<0.000000e+00> : vector<8x384xf32>
    %32 = tpu.matmul %29, %31, %cst_16 {dimension_numbers = #tpu.dot_dimension_numbers<[1], [0], [0], [1], [0, 0, 1, 1], [], []>} : vector<8x128xbf16>, vector<128x384xbf16>, vector<8x384xf32> -> vector<8x384xf32>
    %c0_17 = arith.constant 0 : index
    %c0_18 = arith.constant 0 : index
    %c0_19 = arith.constant 0 : index
    %33 = vector.load %arg10[%c0_17, %c0_18, %c0_19] : memref<1x1x384xf32, #tpu.memory_space<vmem>>, vector<1x1x384xf32>
    %34 = vector.shape_cast %33 : vector<1x1x384xf32> to vector<1x384xf32>
    %35 = vector.broadcast %34 : vector<1x384xf32> to vector<8x384xf32>
    %36 = arith.addf %32, %35 : vector<8x384xf32>
    %37 = tpu.iota {dimensions = array<i32: 1>} : vector<8x8xi32>
    %c5_i32 = arith.constant 5 : i32
    %38 = vector.broadcast %c5_i32 : i32 to vector<8x8xi32>
    %39 = arith.cmpi sge, %37, %38 : vector<8x8xi32>
    %40 = vector.extract_strided_slice %36 {offsets = [0, 0], sizes = [8, 32], strides = [1, 1]} : vector<8x384xf32> to vector<8x32xf32>
    %cst_20 = arith.constant 0.176776692 : f32
    %41 = vector.broadcast %cst_20 : f32 to vector<8x32xf32>
    %42 = arith.mulf %40, %41 : vector<8x32xf32>
    %43 = vector.extract_strided_slice %36 {offsets = [0, 128], sizes = [8, 32], strides = [1, 1]} : vector<8x384xf32> to vector<8x32xf32>
    %44 = vector.extract_strided_slice %36 {offsets = [0, 256], sizes = [8, 32], strides = [1, 1]} : vector<8x384xf32> to vector<8x32xf32>
    %45 = arith.truncf %42 : vector<8x32xf32> to vector<8x32xbf16>
    %46 = arith.truncf %43 : vector<8x32xf32> to vector<8x32xbf16>
    %cst_21 = arith.constant dense<0.000000e+00> : vector<8x8xf32>
    %47 = tpu.matmul %45, %46, %cst_21 {dimension_numbers = #tpu.dot_dimension_numbers<[1], [1], [0], [0], [0, 0, 1, 0], [], []>} : vector<8x32xbf16>, vector<8x32xbf16>, vector<8x8xf32> -> vector<8x8xf32>
    %cst_22 = arith.constant -1.000000e+30 : f32
    %48 = vector.broadcast %cst_22 : f32 to vector<8x8xf32>
    %49 = arith.select %39, %48, %47 : vector<8x8xi1>, vector<8x8xf32>
    %cst_23 = arith.constant dense<0xFF800000> : vector<8xf32>
    %50 = vector.multi_reduction <maximumf>, %49, %cst_23 [1] : vector<8x8xf32> to vector<8xf32>
    %51 = vector.shape_cast %50 : vector<8xf32> to vector<8x1xf32>
    %52 = vector.broadcast %51 : vector<8x1xf32> to vector<8x8xf32>
    %53 = arith.subf %49, %52 : vector<8x8xf32>
    %54 = math.exp %53 : vector<8x8xf32>
    %cst_24 = arith.constant dense<0.000000e+00> : vector<8xf32>
    %55 = vector.multi_reduction <add>, %54, %cst_24 [1] : vector<8x8xf32> to vector<8xf32>
    %56 = vector.shape_cast %55 : vector<8xf32> to vector<8x1xf32>
    %57 = tpu.reciprocal %56 {approx = true} : vector<8x1xf32> -> vector<8x1xf32>
    %58 = vector.broadcast %57 : vector<8x1xf32> to vector<8x8xf32>
    %59 = arith.mulf %54, %58 : vector<8x8xf32>
    %60 = arith.truncf %59 : vector<8x8xf32> to vector<8x8xbf16>
    %61 = arith.truncf %44 : vector<8x32xf32> to vector<8x32xbf16>
    %cst_25 = arith.constant dense<0.000000e+00> : vector<8x32xf32>
    %62 = tpu.matmul %60, %61, %cst_25 {dimension_numbers = #tpu.dot_dimension_numbers<[1], [0], [0], [1], [0, 0, 1, 1], [], []>} : vector<8x8xbf16>, vector<8x32xbf16>, vector<8x32xf32> -> vector<8x32xf32>
    %63 = vector.extract_strided_slice %36 {offsets = [0, 32], sizes = [8, 32], strides = [1, 1]} : vector<8x384xf32> to vector<8x32xf32>
    %cst_26 = arith.constant 0.176776692 : f32
    %64 = vector.broadcast %cst_26 : f32 to vector<8x32xf32>
    %65 = arith.mulf %63, %64 : vector<8x32xf32>
    %66 = vector.extract_strided_slice %36 {offsets = [0, 160], sizes = [8, 32], strides = [1, 1]} : vector<8x384xf32> to vector<8x32xf32>
    %67 = vector.extract_strided_slice %36 {offsets = [0, 288], sizes = [8, 32], strides = [1, 1]} : vector<8x384xf32> to vector<8x32xf32>
    %68 = arith.truncf %65 : vector<8x32xf32> to vector<8x32xbf16>
    %69 = arith.truncf %66 : vector<8x32xf32> to vector<8x32xbf16>
    %cst_27 = arith.constant dense<0.000000e+00> : vector<8x8xf32>
    %70 = tpu.matmul %68, %69, %cst_27 {dimension_numbers = #tpu.dot_dimension_numbers<[1], [1], [0], [0], [0, 0, 1, 0], [], []>} : vector<8x32xbf16>, vector<8x32xbf16>, vector<8x8xf32> -> vector<8x8xf32>
    %cst_28 = arith.constant -1.000000e+30 : f32
    %71 = vector.broadcast %cst_28 : f32 to vector<8x8xf32>
    %72 = arith.select %39, %71, %70 : vector<8x8xi1>, vector<8x8xf32>
    %cst_29 = arith.constant dense<0xFF800000> : vector<8xf32>
    %73 = vector.multi_reduction <maximumf>, %72, %cst_29 [1] : vector<8x8xf32> to vector<8xf32>
    %74 = vector.shape_cast %73 : vector<8xf32> to vector<8x1xf32>
    %75 = vector.broadcast %74 : vector<8x1xf32> to vector<8x8xf32>
    %76 = arith.subf %72, %75 : vector<8x8xf32>
    %77 = math.exp %76 : vector<8x8xf32>
    %cst_30 = arith.constant dense<0.000000e+00> : vector<8xf32>
    %78 = vector.multi_reduction <add>, %77, %cst_30 [1] : vector<8x8xf32> to vector<8xf32>
    %79 = vector.shape_cast %78 : vector<8xf32> to vector<8x1xf32>
    %80 = tpu.reciprocal %79 {approx = true} : vector<8x1xf32> -> vector<8x1xf32>
    %81 = vector.broadcast %80 : vector<8x1xf32> to vector<8x8xf32>
    %82 = arith.mulf %77, %81 : vector<8x8xf32>
    %83 = arith.truncf %82 : vector<8x8xf32> to vector<8x8xbf16>
    %84 = arith.truncf %67 : vector<8x32xf32> to vector<8x32xbf16>
    %cst_31 = arith.constant dense<0.000000e+00> : vector<8x32xf32>
    %85 = tpu.matmul %83, %84, %cst_31 {dimension_numbers = #tpu.dot_dimension_numbers<[1], [0], [0], [1], [0, 0, 1, 1], [], []>} : vector<8x8xbf16>, vector<8x32xbf16>, vector<8x32xf32> -> vector<8x32xf32>
    %86 = vector.extract_strided_slice %36 {offsets = [0, 64], sizes = [8, 32], strides = [1, 1]} : vector<8x384xf32> to vector<8x32xf32>
    %cst_32 = arith.constant 0.176776692 : f32
    %87 = vector.broadcast %cst_32 : f32 to vector<8x32xf32>
    %88 = arith.mulf %86, %87 : vector<8x32xf32>
    %89 = vector.extract_strided_slice %36 {offsets = [0, 192], sizes = [8, 32], strides = [1, 1]} : vector<8x384xf32> to vector<8x32xf32>
    %90 = vector.extract_strided_slice %36 {offsets = [0, 320], sizes = [8, 32], strides = [1, 1]} : vector<8x384xf32> to vector<8x32xf32>
    %91 = arith.truncf %88 : vector<8x32xf32> to vector<8x32xbf16>
    %92 = arith.truncf %89 : vector<8x32xf32> to vector<8x32xbf16>
    %cst_33 = arith.constant dense<0.000000e+00> : vector<8x8xf32>
    %93 = tpu.matmul %91, %92, %cst_33 {dimension_numbers = #tpu.dot_dimension_numbers<[1], [1], [0], [0], [0, 0, 1, 0], [], []>} : vector<8x32xbf16>, vector<8x32xbf16>, vector<8x8xf32> -> vector<8x8xf32>
    %cst_34 = arith.constant -1.000000e+30 : f32
    %94 = vector.broadcast %cst_34 : f32 to vector<8x8xf32>
    %95 = arith.select %39, %94, %93 : vector<8x8xi1>, vector<8x8xf32>
    %cst_35 = arith.constant dense<0xFF800000> : vector<8xf32>
    %96 = vector.multi_reduction <maximumf>, %95, %cst_35 [1] : vector<8x8xf32> to vector<8xf32>
    %97 = vector.shape_cast %96 : vector<8xf32> to vector<8x1xf32>
    %98 = vector.broadcast %97 : vector<8x1xf32> to vector<8x8xf32>
    %99 = arith.subf %95, %98 : vector<8x8xf32>
    %100 = math.exp %99 : vector<8x8xf32>
    %cst_36 = arith.constant dense<0.000000e+00> : vector<8xf32>
    %101 = vector.multi_reduction <add>, %100, %cst_36 [1] : vector<8x8xf32> to vector<8xf32>
    %102 = vector.shape_cast %101 : vector<8xf32> to vector<8x1xf32>
    %103 = tpu.reciprocal %102 {approx = true} : vector<8x1xf32> -> vector<8x1xf32>
    %104 = vector.broadcast %103 : vector<8x1xf32> to vector<8x8xf32>
    %105 = arith.mulf %100, %104 : vector<8x8xf32>
    %106 = arith.truncf %105 : vector<8x8xf32> to vector<8x8xbf16>
    %107 = arith.truncf %90 : vector<8x32xf32> to vector<8x32xbf16>
    %cst_37 = arith.constant dense<0.000000e+00> : vector<8x32xf32>
    %108 = tpu.matmul %106, %107, %cst_37 {dimension_numbers = #tpu.dot_dimension_numbers<[1], [0], [0], [1], [0, 0, 1, 1], [], []>} : vector<8x8xbf16>, vector<8x32xbf16>, vector<8x32xf32> -> vector<8x32xf32>
    %109 = vector.extract_strided_slice %36 {offsets = [0, 96], sizes = [8, 32], strides = [1, 1]} : vector<8x384xf32> to vector<8x32xf32>
    %cst_38 = arith.constant 0.176776692 : f32
    %110 = vector.broadcast %cst_38 : f32 to vector<8x32xf32>
    %111 = arith.mulf %109, %110 : vector<8x32xf32>
    %112 = vector.extract_strided_slice %36 {offsets = [0, 224], sizes = [8, 32], strides = [1, 1]} : vector<8x384xf32> to vector<8x32xf32>
    %113 = vector.extract_strided_slice %36 {offsets = [0, 352], sizes = [8, 32], strides = [1, 1]} : vector<8x384xf32> to vector<8x32xf32>
    %114 = arith.truncf %111 : vector<8x32xf32> to vector<8x32xbf16>
    %115 = arith.truncf %112 : vector<8x32xf32> to vector<8x32xbf16>
    %cst_39 = arith.constant dense<0.000000e+00> : vector<8x8xf32>
    %116 = tpu.matmul %114, %115, %cst_39 {dimension_numbers = #tpu.dot_dimension_numbers<[1], [1], [0], [0], [0, 0, 1, 0], [], []>} : vector<8x32xbf16>, vector<8x32xbf16>, vector<8x8xf32> -> vector<8x8xf32>
    %cst_40 = arith.constant -1.000000e+30 : f32
    %117 = vector.broadcast %cst_40 : f32 to vector<8x8xf32>
    %118 = arith.select %39, %117, %116 : vector<8x8xi1>, vector<8x8xf32>
    %cst_41 = arith.constant dense<0xFF800000> : vector<8xf32>
    %119 = vector.multi_reduction <maximumf>, %118, %cst_41 [1] : vector<8x8xf32> to vector<8xf32>
    %120 = vector.shape_cast %119 : vector<8xf32> to vector<8x1xf32>
    %121 = vector.broadcast %120 : vector<8x1xf32> to vector<8x8xf32>
    %122 = arith.subf %118, %121 : vector<8x8xf32>
    %123 = math.exp %122 : vector<8x8xf32>
    %cst_42 = arith.constant dense<0.000000e+00> : vector<8xf32>
    %124 = vector.multi_reduction <add>, %123, %cst_42 [1] : vector<8x8xf32> to vector<8xf32>
    %125 = vector.shape_cast %124 : vector<8xf32> to vector<8x1xf32>
    %126 = tpu.reciprocal %125 {approx = true} : vector<8x1xf32> -> vector<8x1xf32>
    %127 = vector.broadcast %126 : vector<8x1xf32> to vector<8x8xf32>
    %128 = arith.mulf %123, %127 : vector<8x8xf32>
    %129 = arith.truncf %128 : vector<8x8xf32> to vector<8x8xbf16>
    %130 = arith.truncf %113 : vector<8x32xf32> to vector<8x32xbf16>
    %cst_43 = arith.constant dense<0.000000e+00> : vector<8x32xf32>
    %131 = tpu.matmul %129, %130, %cst_43 {dimension_numbers = #tpu.dot_dimension_numbers<[1], [0], [0], [1], [0, 0, 1, 1], [], []>} : vector<8x8xbf16>, vector<8x32xbf16>, vector<8x32xf32> -> vector<8x32xf32>
    %132 = tpu.concatenate %62, %85, %108, %131 in 1 : vector<8x32xf32>, vector<8x32xf32>, vector<8x32xf32>, vector<8x32xf32> -> vector<8x128xf32>
    %133 = arith.truncf %132 : vector<8x128xf32> to vector<8x128xbf16>
    %c0_44 = arith.constant 0 : index
    %c0_45 = arith.constant 0 : index
    %c0_46 = arith.constant 0 : index
    %134 = vector.load %arg11[%c0_44, %c0_45, %c0_46] : memref<1x128x128xbf16, #tpu.memory_space<vmem>>, vector<1x128x128xbf16>
    %135 = vector.shape_cast %134 : vector<1x128x128xbf16> to vector<128x128xbf16>
    %cst_47 = arith.constant dense<0.000000e+00> : vector<8x128xf32>
    %136 = tpu.matmul %133, %135, %cst_47 {dimension_numbers = #tpu.dot_dimension_numbers<[1], [0], [0], [1], [0, 0, 1, 1], [], []>} : vector<8x128xbf16>, vector<128x128xbf16>, vector<8x128xf32> -> vector<8x128xf32>
    %c0_48 = arith.constant 0 : index
    %c0_49 = arith.constant 0 : index
    %c0_50 = arith.constant 0 : index
    %137 = vector.load %arg12[%c0_48, %c0_49, %c0_50] : memref<1x1x128xf32, #tpu.memory_space<vmem>>, vector<1x1x128xf32>
    %138 = vector.shape_cast %137 : vector<1x1x128xf32> to vector<1x128xf32>
    %139 = vector.broadcast %138 : vector<1x128xf32> to vector<8x128xf32>
    %140 = arith.addf %136, %139 : vector<8x128xf32>
    %141 = arith.addf %4, %140 : vector<8x128xf32>
    %c0_51 = arith.constant 0 : index
    %c0_52 = arith.constant 0 : index
    %c0_53 = arith.constant 0 : index
    %142 = vector.load %arg13[%c0_51, %c0_52, %c0_53] : memref<1x1x128xf32, #tpu.memory_space<vmem>>, vector<1x1x128xf32>
    %143 = vector.shape_cast %142 : vector<1x1x128xf32> to vector<1x128xf32>
    %c0_54 = arith.constant 0 : index
    %c0_55 = arith.constant 0 : index
    %c0_56 = arith.constant 0 : index
    %144 = vector.load %arg14[%c0_54, %c0_55, %c0_56] : memref<1x1x128xf32, #tpu.memory_space<vmem>>, vector<1x1x128xf32>
    %145 = vector.shape_cast %144 : vector<1x1x128xf32> to vector<1x128xf32>
    %cst_57 = arith.constant dense<0.000000e+00> : vector<8xf32>
    %146 = vector.multi_reduction <add>, %141, %cst_57 [1] : vector<8x128xf32> to vector<8xf32>
    %147 = vector.shape_cast %146 : vector<8xf32> to vector<8x1xf32>
    %cst_58 = arith.constant 1.280000e+02 : f32
    %148 = vector.broadcast %cst_58 : f32 to vector<8x1xf32>
    %149 = arith.divf %147, %148 : vector<8x1xf32>
    %150 = vector.broadcast %149 : vector<8x1xf32> to vector<8x128xf32>
    %151 = arith.subf %141, %150 : vector<8x128xf32>
    %152 = arith.mulf %151, %151 : vector<8x128xf32>
    %cst_59 = arith.constant dense<0.000000e+00> : vector<8xf32>
    %153 = vector.multi_reduction <add>, %152, %cst_59 [1] : vector<8x128xf32> to vector<8xf32>
    %154 = vector.shape_cast %153 : vector<8xf32> to vector<8x1xf32>
    %cst_60 = arith.constant 1.280000e+02 : f32
    %155 = vector.broadcast %cst_60 : f32 to vector<8x1xf32>
    %156 = arith.divf %154, %155 : vector<8x1xf32>
    %cst_61 = arith.constant 9.99999997E-7 : f32
    %157 = vector.broadcast %cst_61 : f32 to vector<8x1xf32>
    %158 = arith.addf %156, %157 : vector<8x1xf32>
    %159 = math.rsqrt %158 : vector<8x1xf32>
    %160 = vector.broadcast %159 : vector<8x1xf32> to vector<8x128xf32>
    %161 = arith.mulf %151, %160 : vector<8x128xf32>
    %162 = vector.broadcast %143 : vector<1x128xf32> to vector<8x128xf32>
    %163 = arith.mulf %161, %162 : vector<8x128xf32>
    %164 = vector.broadcast %145 : vector<1x128xf32> to vector<8x128xf32>
    %165 = arith.addf %163, %164 : vector<8x128xf32>
    %166 = arith.truncf %165 : vector<8x128xf32> to vector<8x128xbf16>
    %c0_62 = arith.constant 0 : index
    %c0_63 = arith.constant 0 : index
    %c0_64 = arith.constant 0 : index
    %167 = vector.load %arg15[%c0_62, %c0_63, %c0_64] : memref<1x128x256xbf16, #tpu.memory_space<vmem>>, vector<1x128x256xbf16>
    %168 = vector.shape_cast %167 : vector<1x128x256xbf16> to vector<128x256xbf16>
    %cst_65 = arith.constant dense<0.000000e+00> : vector<8x256xf32>
    %169 = tpu.matmul %166, %168, %cst_65 {dimension_numbers = #tpu.dot_dimension_numbers<[1], [0], [0], [1], [0, 0, 1, 1], [], []>} : vector<8x128xbf16>, vector<128x256xbf16>, vector<8x256xf32> -> vector<8x256xf32>
    %c0_66 = arith.constant 0 : index
    %c0_67 = arith.constant 0 : index
    %c0_68 = arith.constant 0 : index
    %170 = vector.load %arg16[%c0_66, %c0_67, %c0_68] : memref<1x1x256xf32, #tpu.memory_space<vmem>>, vector<1x1x256xf32>
    %171 = vector.shape_cast %170 : vector<1x1x256xf32> to vector<1x256xf32>
    %172 = vector.broadcast %171 : vector<1x256xf32> to vector<8x256xf32>
    %173 = arith.addf %169, %172 : vector<8x256xf32>
    %cst_69 = arith.constant 5.000000e-01 : f32
    %174 = vector.broadcast %cst_69 : f32 to vector<8x256xf32>
    %175 = arith.mulf %174, %173 : vector<8x256xf32>
    %cst_70 = arith.constant 4.471500e-02 : f32
    %176 = vector.broadcast %cst_70 : f32 to vector<8x256xf32>
    %177 = arith.mulf %176, %173 : vector<8x256xf32>
    %178 = arith.mulf %177, %173 : vector<8x256xf32>
    %179 = arith.mulf %178, %173 : vector<8x256xf32>
    %180 = arith.addf %173, %179 : vector<8x256xf32>
    %cst_71 = arith.constant 0.797884583 : f32
    %181 = vector.broadcast %cst_71 : f32 to vector<8x256xf32>
    %182 = arith.mulf %181, %180 : vector<8x256xf32>
    %183 = math.tanh %182 : vector<8x256xf32>
    %cst_72 = arith.constant 1.000000e+00 : f32
    %184 = vector.broadcast %cst_72 : f32 to vector<8x256xf32>
    %185 = arith.addf %184, %183 : vector<8x256xf32>
    %186 = arith.mulf %175, %185 : vector<8x256xf32>
    %187 = arith.truncf %186 : vector<8x256xf32> to vector<8x256xbf16>
    %c0_73 = arith.constant 0 : index
    %c0_74 = arith.constant 0 : index
    %c0_75 = arith.constant 0 : index
    %188 = vector.load %arg17[%c0_73, %c0_74, %c0_75] : memref<1x256x128xbf16, #tpu.memory_space<vmem>>, vector<1x256x128xbf16>
    %189 = vector.shape_cast %188 : vector<1x256x128xbf16> to vector<256x128xbf16>
    %cst_76 = arith.constant dense<0.000000e+00> : vector<8x128xf32>
    %190 = tpu.matmul %187, %189, %cst_76 {dimension_numbers = #tpu.dot_dimension_numbers<[1], [0], [0], [1], [0, 0, 1, 1], [], []>} : vector<8x256xbf16>, vector<256x128xbf16>, vector<8x128xf32> -> vector<8x128xf32>
    %c0_77 = arith.constant 0 : index
    %c0_78 = arith.constant 0 : index
    %c0_79 = arith.constant 0 : index
    %191 = vector.load %arg18[%c0_77, %c0_78, %c0_79] : memref<1x1x128xf32, #tpu.memory_space<vmem>>, vector<1x1x128xf32>
    %192 = vector.shape_cast %191 : vector<1x1x128xf32> to vector<1x128xf32>
    %193 = vector.broadcast %192 : vector<1x128xf32> to vector<8x128xf32>
    %194 = arith.addf %190, %193 : vector<8x128xf32>
    %195 = arith.addf %141, %194 : vector<8x128xf32>
    %c0_80 = arith.constant 0 : index
    %c0_81 = arith.constant 0 : index
    %c0_82 = arith.constant 0 : index
    %196 = vector.load %arg19[%c0_80, %c0_81, %c0_82] : memref<1x8x128xf32, #tpu.memory_space<vmem>>, vector<1x8x128xf32>
    %197 = vector.shape_cast %196 : vector<1x8x128xf32> to vector<8x128xf32>
    %198 = vector.shape_cast %195 : vector<8x128xf32> to vector<1x8x128xf32>
    tpu.vector_store %arg19[%c0_80, %c0_81, %c0_82], %198 {strides = array<i32>} : memref<1x8x128xf32, #tpu.memory_space<vmem>>, vector<1x8x128xf32>,
    return
  }
  func.func @transform_0(%arg0: i32, %arg1: i32) -> (i32, i32, i32) {
    %c0_i32 = arith.constant 0 : i32
    %c0_i32_0 = arith.constant 0 : i32
    %c0_i32_1 = arith.constant 0 : i32
    return %arg0, %c0_i32, %c0_i32_0 : i32, i32, i32
  }
  func.func @transform_1(%arg0: i32, %arg1: i32) -> (i32, i32) {
    %c0_i32 = arith.constant 0 : i32
    %c0_i32_0 = arith.constant 0 : i32
    %c0_i32_1 = arith.constant 0 : i32
    return %c0_i32, %c0_i32_0 : i32, i32
  }
  func.func @transform_2(%arg0: i32, %arg1: i32) -> (i32, i32) {
    %c0_i32 = arith.constant 0 : i32
    %c0_i32_0 = arith.constant 0 : i32
    %c0_i32_1 = arith.constant 0 : i32
    return %c0_i32, %c0_i32_0 : i32, i32
  }
  func.func @transform_3(%arg0: i32, %arg1: i32) -> (i32, i32) {
    %c0_i32 = arith.constant 0 : i32
    %c0_i32_0 = arith.constant 0 : i32
    %c0_i32_1 = arith.constant 0 : i32
    return %c0_i32, %c0_i32_0 : i32, i32
  }
  func.func @transform_4(%arg0: i32, %arg1: i32) -> (i32, i32) {
    %c0_i32 = arith.constant 0 : i32
    %c0_i32_0 = arith.constant 0 : i32
    %c0_i32_1 = arith.constant 0 : i32
    return %c0_i32, %c0_i32_0 : i32, i32
  }
  func.func @transform_5(%arg0: i32, %arg1: i32) -> (i32, i32, i32) {
    %c0_i32 = arith.constant 0 : i32
    %c0_i32_0 = arith.constant 0 : i32
    %c0_i32_1 = arith.constant 0 : i32
    return %arg1, %c0_i32, %c0_i32_0 : i32, i32, i32
  }
  func.func @transform_6(%arg0: i32, %arg1: i32) -> (i32, i32, i32) {
    %c0_i32 = arith.constant 0 : i32
    %c0_i32_0 = arith.constant 0 : i32
    %c0_i32_1 = arith.constant 0 : i32
    return %arg1, %c0_i32, %c0_i32_0 : i32, i32, i32
  }
  func.func @transform_7(%arg0: i32, %arg1: i32) -> (i32, i32, i32) {
    %c0_i32 = arith.constant 0 : i32
    %c0_i32_0 = arith.constant 0 : i32
    %c0_i32_1 = arith.constant 0 : i32
    return %arg1, %c0_i32, %c0_i32_0 : i32, i32, i32
  }
  func.func @transform_8(%arg0: i32, %arg1: i32) -> (i32, i32, i32) {
    %c0_i32 = arith.constant 0 : i32
    %c0_i32_0 = arith.constant 0 : i32
    %c0_i32_1 = arith.constant 0 : i32
    return %arg1, %c0_i32, %c0_i32_0 : i32, i32, i32
  }
  func.func @transform_9(%arg0: i32, %arg1: i32) -> (i32, i32, i32) {
    %c0_i32 = arith.constant 0 : i32
    %c0_i32_0 = arith.constant 0 : i32
    %c0_i32_1 = arith.constant 0 : i32
    return %arg1, %c0_i32, %c0_i32_0 : i32, i32, i32
  }
  func.func @transform_10(%arg0: i32, %arg1: i32) -> (i32, i32, i32) {
    %c0_i32 = arith.constant 0 : i32
    %c0_i32_0 = arith.constant 0 : i32
    %c0_i32_1 = arith.constant 0 : i32
    return %arg1, %c0_i32, %c0_i32_0 : i32, i32, i32
  }
  func.func @transform_11(%arg0: i32, %arg1: i32) -> (i32, i32, i32) {
    %c0_i32 = arith.constant 0 : i32
    %c0_i32_0 = arith.constant 0 : i32
    %c0_i32_1 = arith.constant 0 : i32
    return %arg1, %c0_i32, %c0_i32_0 : i32, i32, i32
  }
  func.func @transform_12(%arg0: i32, %arg1: i32) -> (i32, i32, i32) {
    %c0_i32 = arith.constant 0 : i32
    %c0_i32_0 = arith.constant 0 : i32
    %c0_i32_1 = arith.constant 0 : i32
    return %arg1, %c0_i32, %c0_i32_0 : i32, i32, i32
  }
  func.func @transform_13(%arg0: i32, %arg1: i32) -> (i32, i32, i32) {
    %c0_i32 = arith.constant 0 : i32
    %c0_i32_0 = arith.constant 0 : i32
    %c0_i32_1 = arith.constant 0 : i32
    return %arg1, %c0_i32, %c0_i32_0 : i32, i32, i32
  }
  func.func @transform_14(%arg0: i32, %arg1: i32) -> (i32, i32, i32) {
    %c0_i32 = arith.constant 0 : i32
    %c0_i32_0 = arith.constant 0 : i32
    %c0_i32_1 = arith.constant 0 : i32
    return %arg1, %c0_i32, %c0_i32_0 : i32, i32, i32
  }
  func.func @transform_15(%arg0: i32, %arg1: i32) -> (i32, i32, i32) {
    %c0_i32 = arith.constant 0 : i32
    %c0_i32_0 = arith.constant 0 : i32
    %c0_i32_1 = arith.constant 0 : i32
    return %arg1, %c0_i32, %c0_i32_0 : i32, i32, i32
  }
  func.func @transform_16(%arg0: i32, %arg1: i32) -> (i32, i32, i32) {
    %c0_i32 = arith.constant 0 : i32
    %c0_i32_0 = arith.constant 0 : i32
    %c0_i32_1 = arith.constant 0 : i32
    return %arg1, %c0_i32, %c0_i32_0 : i32, i32, i32
  }
  func.func @transform_17(%arg0: i32, %arg1: i32) -> (i32, i32, i32) {
    %c0_i32 = arith.constant 0 : i32
    %c0_i32_0 = arith.constant 0 : i32
    %c0_i32_1 = arith.constant 0 : i32
    return %arg0, %c0_i32, %c0_i32_0 : i32, i32, i32
  }
}

</mosaic_0001>

<bundles_post_ra>
// kernel: spectral_vit_forward.2
= control target key start
LH: loop header
LB: loop body
LE: loop exit
PB: predicated region body
PF: predicated region fallthrough
CT: control target
= control target key end

     0   :  { %s2307_s18 = smov 0   ;;  %s2537_s0 = inlined_call_operand.vmem [shape: f32[2,8,36], index: 0, kind: input, shape index: {}]   ;;  %s2538_s1 = inlined_call_operand.vmem [shape: f32[12,8], index: 1, kind: input, shape index: {}]   ;;  %s2539_s2 = inlined_call_operand.vmem [shape: f32[12,1], index: 2, kind: input, shape index: {}]   ;;  %s2540_s3 = inlined_call_operand.vmem [shape: f32[3,16,4], index: 3, kind: input, shape index: {}]   ;;  %s2541_s4 = inlined_call_operand.vmem [shape: f32[16,12], index: 4, kind: input, shape index: {}]   ;;  %s2542_s5 = inlined_call_operand.vmem [shape: f32[2,3,16,16], index: 5, kind: output, shape index: {}]  }
   0x1 LB: > { %s2007_s19 = sadd.s32 4294967295, %s2270_s18   ;;  %p2011_p0 = scmp.ge.s32.totalorder %s2270_s18, 1  ;;  %s2270_s18 = sphi %s2307_s18, %s15_s18  }
   0x2   : > { %p186_p1 = scmp.lt.s32.totalorder %s2270_s18, 3 }
   0x4   : > { %p187_p2 = pnand %p2011_p0, %p186_p1 }
   0x5   : > { %p213_p3 = scmp.lt.s32.totalorder (!%p187_p2), %s2007_s19, 1  ;;  %s2275_s26 = smov (!%p187_p2), 116  }
   0x6   : > { %190 = sbr.rel (%p187_p2) target bundleno = 1735 (0x6c7), region = 40  ;;  %s2276_s29 = smov (!%p187_p2), 104  }
   0xb   : > { %v2272_v0 = vmov 0.0   ;;  %vm2273_vm0 = vmmov 0   ;;  %s2544_s19 = smov (!%p213_p3, %s2007_s19), 1  ;;  %v2274_v1 = vmov 0   ;;  %v223_v2 = vld [vmem:[%s2538_s1] sm:$0xf] }
   0xc   : > { %2137 = vmatprep.subr.mxu1 %v2272_v0  ;;  %2139 = vmatprep.mubr.msk.f32.mxu1 %vm2273_vm0, %v2272_v0  ;;  %s2012_s20 = sshll.u32 %s2544_s19, 3  ;;  %vm230_vm1 = vcmask 64512   ;;  %v224_v4 = vld [vmem:[%s2539_s2] sm:$0xf]  ;;  %v2346_v6 = vld [vmem:[%s2540_s3 + $0x10] sm:$0xff]  ;;  %vm383_vm2 = vcmask 31744  }
   0xd   : > { %2262 = vset.pattern.permute.xlu0 %v2274_v1  ;;  %2263 = vset.pattern.permute.xlu1 %v2274_v1  ;;  %s216_s23 = scalar_lea.vmem %s2537_s0, %s2012_s20  ;;  %v2351_v7 = vld [vmem:[%s2540_s3] sm:$0xff]  ;;  %vm390_vm3 = vcmask 1043456   ;;  %v2360_v12 = vld [vmem:[%s2540_s3 + $0x8] sm:$0xff]  ;;  %v2369_v16 = vld [vmem:[%s2540_s3 + $0x18] sm:$0xff]  ;;  %vm717_vm4 = vcmask 97280   ;;  %vm805_vm5 = vcmask 130048  }
   0xe   : > { %v2327_v3 = vld [vmem:[%s216_s23] sm:$0xff]  ;;  %2149 = vmatprep.mubr.msk.f32.mxu0 %vm383_vm2, %v2346_v6  ;;  %v2395_v20 = vld [vmem:[%s2541_s4 + $0x8] sm:$0xff] }
   0xf   : > { %307 = vrot.lane.b32.xlu0 %v2327_v3, %s2275_s26  ;;  %2138 = vmatpush3.msra.mxu1 %v2327_v3  ;;  %v2385_v18 = vld [vmem:[%s2540_s3 + $0x20] sm:$0xff]  ;;  %v1381_v21 = vld [vmem:[%s2539_s2 + $0x8] sm:$0xf] }
  0x10   : > { %2140 = vmatmul.mubr.msk.f32.vlgmr.msra.gmra.mxu1 %vm230_vm1, %v223_v2  ;;  %2142 = vmatprep.subr.mxu1 %v2272_v0  ;;  %v809_v19 = vld [vmem:[%s2539_s2 + $0x4] sm:$0xf]  ;;  %v2407_v27 = vld [vmem:[%s2540_s3 + $0x28] sm:$0xff] }
  0x11   : > { %2144 = vmatprep.mubr.msk.f32.mxu1 %vm2273_vm0, %v2272_v0  ;;  %553 = vrot.lane.b32.xlu1 %v2327_v3, %s2276_s29  ;;  %v808_v28 = vld [vmem:[%s2538_s1 + $0x4] sm:$0xf]  ;;  %s2248_s29 = smul.u32 48, %s2544_s19  ;;  %v1380_v52 = vld [vmem:[%s2538_s1 + $0x8] sm:$0xf] }
  0x12   : > { %v2431_v29 = vld [vmem:[%s2541_s4] sm:$0xff] }
  0x13   : > { %227 = vperm.xlu0 %2262, %v224_v4   ;;  %s2468_s7 = scalar_lea.vmem %s2542_s5, %s2248_s29 }
  0x15   : > { %812 = vperm.xlu1 %2263, %v809_v19  }
  0x19   : > { %1384 = vperm.xlu1 %2263, %v1381_v21  }
  0x81   : > { %v2339_v5 = vpop.permute.xlu0 %307 }
  0x82   : > { %2143 = vmatpush3.msra.mxu1 %v2339_v5 }
  0x83   : > { %2145 = vmatmul.mubr.msk.f32.vlgmr.msra.gmra.mxu1 %vm230_vm1, %v223_v2  ;;  %v2372_v17 = vpop.permute.xlu1 %553 }
  0x84   : > { %2154 = vmatprep.mubr.msk.f32.mxu1 %vm383_vm2, %v2351_v7 }
  0x8e   : > { %v228_v8 = vpop.permute.xlu0 %227 }
  0x90   : > { %v813_v36 = vpop.permute.xlu1 %812 }
  0x94   : > { %v1385_v60 = vpop.permute.xlu1 %1384 }
  0xd0   : > { %v300_v9 = vpop.f32.mrf.mxu1 }
  0xd1   : > { %v301_v10 = vadd.f32 %v300_v9, %v228_v8 }
  0xd2   : > { %v2141_v11 = vpop.f32.mrf.mxu1 }
  0xd3   : > { %2152 = vmatprep.subr.msk.mxu1 %vm390_vm3, %v301_v10 }
  0xd4   : > { %2153 = vmatpush3.msk.msra.mxu1 %vm390_vm3, %v301_v10 }
  0xd5   : > { %2155 = vmatmul.mubr.msk.f32.vlgmr.msra.gmra.mxu1 %vm383_vm2, %v2360_v12 }
  0xd6   : > { %2164 = vmatprep.mubr.msk.f32.mxu1 %vm383_vm2, %v2385_v18 }
 0x143   : > { %v376_v13 = vpop.f32.mrf.mxu1 }
 0x144   : > { %v377_v14 = vadd.f32 %v376_v13, %v228_v8 }
 0x145   : > { %v2146_v15 = vpop.f32.mrf.mxu1 }
 0x146   : > { %2147 = vmatprep.subr.msk.mxu0 %vm390_vm3, %v377_v14 }
 0x147   : > { %2148 = vmatpush3.msk.msra.mxu0 %vm390_vm3, %v377_v14 }
 0x148   : > { %2150 = vmatmul.mubr.msk.f32.vlgmr.msra.gmra.mxu0 %vm383_vm2, %v2369_v16  ;;  %2157 = vmatprep.subr.mxu0 %v2272_v0 }
 0x149   : > { %2158 = vmatpush3.msra.mxu0 %v2372_v17  ;;  %2159 = vmatprep.mubr.msk.f32.mxu0 %vm2273_vm0, %v2272_v0 }
 0x14a   : > { %2167 = vmatprep.subr.msk.mxu0 %vm717_vm4, %v2395_v20 }
 0x14c   : > { %2160 = vmatmul.mubr.msk.f32.vlgmr.msra.gmra.mxu0 %vm230_vm1, %v223_v2 }
 0x14d   : > { %2168 = vmatpush3.xpose.msk.msra.mxu0 %vm717_vm4, %v2395_v20 }
 0x14e   : > { %2169 = vmatprep.subr.msk.mxu0 %vm717_vm4, %v2431_v29 }
 0x151   : > { %2170 = vmatpush3.xpose.msk.msra.mxu0 %vm717_vm4, %v2431_v29 }
 0x195   : > { %v2156_v30 = vpop.f32.mrf.mxu1 }
 0x197   : > { %v544_v31 = vpop.f32.mrf.mxu1 }
 0x208   : > { %v2151_v22 = vpop.f32.mrf.mxu0 }
 0x209   : > { %v550_v34 = vadd.f32 %v2156_v30, %v2151_v22 }
 0x20a   : > { %v460_v23 = vpop.f32.mrf.mxu0 }
 0x20b   : > { %v545_v33 = vadd.f32 %v544_v31, %v460_v23 }
 0x20c   : > { %v622_v24 = vpop.f32.mrf.mxu0 }
 0x20d   : > { %v623_v25 = vadd.f32 %v622_v24, %v228_v8 }
 0x20e   : > { %v2161_v26 = vpop.f32.mrf.mxu0 }
 0x20f   : > { %2162 = vmatprep.subr.msk.mxu1 %vm390_vm3, %v623_v25 }
 0x210   : > { %2163 = vmatpush3.msk.msra.mxu1 %vm390_vm3, %v623_v25 }
 0x211   : > { %2165 = vmatmul.mubr.msk.f32.vlgmr.msra.gmra.mxu1 %vm383_vm2, %v2407_v27  ;;  %2174 = vmatprep.subr.mxu1 %v2272_v0 }
 0x212   : > { %2175 = vmatpush3.msra.mxu1 %v2327_v3  ;;  %2176 = vmatprep.mubr.msk.f32.mxu1 %vm2273_vm0, %v2272_v0 }
 0x213   : > { %2179 = vmatprep.subr.mxu1 %v2272_v0 }
 0x215   : > { %2177 = vmatmul.mubr.msk.f32.vlgmr.msra.gmra.mxu1 %vm230_vm1, %v808_v28 }
 0x216   : > { %2180 = vmatpush3.msra.mxu1 %v2339_v5  ;;  %2181 = vmatprep.mubr.msk.f32.mxu1 %vm2273_vm0, %v2272_v0 }
 0x219   : > { %2182 = vmatmul.mubr.msk.f32.vlgmr.msra.gmra.mxu1 %vm230_vm1, %v808_v28 }
 0x21a   : > { %2191 = vmatprep.mubr.msk.f32.mxu1 %vm383_vm2, %v2351_v7 }
 0x2d1   : > { %v2166_v32 = vpop.f32.mrf.mxu1 }
 0x2d2   : > { %v714_v38 = vadd.f32 %v2166_v32, %v550_v34 }
 0x2d3   : > { %v704_v35 = vpop.f32.mrf.mxu1 }
 0x2d4   : > { %v713_v37 = vadd.f32 %v704_v35, %v545_v33 }
 0x2d5   : > { %v884_v39 = vpop.f32.mrf.mxu1 }
 0x2d6   : > { %v885_v40 = vadd.f32 %v884_v39, %v813_v36  ;;  %2171 = vmatprep.mubr.msk.f32.mxu0 %vm717_vm4, %v713_v37 }
 0x2d7   : > { %2172 = vmatmul.mubr.msk.f32.vlgmr.msra.gmra.mxu0 %vm717_vm4, %v714_v38  ;;  %v2178_v41 = vpop.f32.mrf.mxu1 }
 0x2d8   : > { %2189 = vmatprep.subr.msk.mxu1 %vm390_vm3, %v885_v40  ;;  %2186 = vmatprep.mubr.msk.f32.mxu0 %vm383_vm2, %v2346_v6 }
 0x2d9   : > { %v956_v42 = vpop.f32.mrf.mxu1  ;;  %2190 = vmatpush3.msk.msra.mxu1 %vm390_vm3, %v885_v40 }
 0x2da   : > { %v957_v43 = vadd.f32 %v956_v42, %v813_v36  ;;  %2192 = vmatmul.mubr.msk.f32.vlgmr.msra.gmra.mxu1 %vm383_vm2, %v2360_v12 }
 0x2db   : > { %v2183_v44 = vpop.f32.mrf.mxu1  ;;  %2201 = vmatprep.mubr.msk.f32.mxu1 %vm383_vm2, %v2385_v18 }
 0x2dc   : > { %2184 = vmatprep.subr.msk.mxu0 %vm390_vm3, %v957_v43 }
 0x2dd   : > { %2185 = vmatpush3.msk.msra.mxu0 %vm390_vm3, %v957_v43 }
 0x2de   : > { %2187 = vmatmul.mubr.msk.f32.vlgmr.msra.gmra.mxu0 %vm383_vm2, %v2369_v16  ;;  %2194 = vmatprep.subr.mxu0 %v2272_v0 }
 0x2df   : > { %2195 = vmatpush3.msra.mxu0 %v2372_v17  ;;  %2196 = vmatprep.mubr.msk.f32.mxu0 %vm2273_vm0, %v2272_v0 }
 0x2e0   : > { %2204 = vmatprep.subr.msk.mxu0 %vm717_vm4, %v2395_v20 }
 0x2e2   : > { %2197 = vmatmul.mubr.msk.f32.vlgmr.msra.gmra.mxu0 %vm230_vm1, %v808_v28 }
 0x2e3   : > { %2205 = vmatpush3.xpose.msk.msra.mxu0 %vm717_vm4, %v2395_v20 }
 0x2e4   : > { %2206 = vmatprep.subr.msk.mxu0 %vm717_vm4, %v2431_v29 }
 0x2e7   : > { %2207 = vmatpush3.xpose.msk.msra.mxu0 %vm717_vm4, %v2431_v29 }
 0x397   : > { %v2173_v45 = vpop.f32.mrf.mxu0 }
 0x398   : > { %807 = vst.msk [vmem:[%s2468_s7 + $0x8] sm:$0xff] %vm805_vm5, %v2173_v45 }
 0x399   : > { %v796_v46 = vpop.f32.mrf.mxu0 }
 0x39a   : > { %806 = vst.msk [vmem:[%s2468_s7] sm:$0xff] %vm805_vm5, %v796_v46  ;;  %v2193_v53 = vpop.f32.mrf.mxu1 }
 0x39c   : > { %v1121_v54 = vpop.f32.mrf.mxu1 }
 0x39e   : > { %v2188_v47 = vpop.f32.mrf.mxu0 }
 0x39f   : > { %v1127_v57 = vadd.f32 %v2193_v53, %v2188_v47 }
 0x3a0   : > { %v1037_v48 = vpop.f32.mrf.mxu0 }
 0x3a1   : > { %v1122_v56 = vadd.f32 %v1121_v54, %v1037_v48 }
 0x3a2   : > { %v1196_v49 = vpop.f32.mrf.mxu0 }
 0x3a3   : > { %v1197_v50 = vadd.f32 %v1196_v49, %v813_v36 }
 0x3a4   : > { %v2198_v51 = vpop.f32.mrf.mxu0 }
 0x3a5   : > { %2199 = vmatprep.subr.msk.mxu1 %vm390_vm3, %v1197_v50 }
 0x3a6   : > { %2200 = vmatpush3.msk.msra.mxu1 %vm390_vm3, %v1197_v50 }
 0x3a7   : > { %2202 = vmatmul.mubr.msk.f32.vlgmr.msra.gmra.mxu1 %vm383_vm2, %v2407_v27  ;;  %2211 = vmatprep.subr.mxu1 %v2272_v0 }
 0x3a8   : > { %2212 = vmatpush3.msra.mxu1 %v2327_v3  ;;  %2213 = vmatprep.mubr.msk.f32.mxu1 %vm2273_vm0, %v2272_v0 }
 0x3a9   : > { %2216 = vmatprep.subr.mxu1 %v2272_v0 }
 0x3ab   : > { %2214 = vmatmul.mubr.msk.f32.vlgmr.msra.gmra.mxu1 %vm230_vm1, %v1380_v52 }
 0x3ac   : > { %2217 = vmatpush3.msra.mxu1 %v2339_v5  ;;  %2218 = vmatprep.mubr.msk.f32.mxu1 %vm2273_vm0, %v2272_v0 }
 0x3af   : > { %2219 = vmatmul.mubr.msk.f32.vlgmr.msra.gmra.mxu1 %vm230_vm1, %v1380_v52 }
 0x3b0   : > { %2228 = vmatprep.mubr.msk.f32.mxu1 %vm383_vm2, %v2351_v7 }
 0x467   : > { %v2203_v55 = vpop.f32.mrf.mxu1 }
 0x468   : > { %v1287_v61 = vadd.f32 %v2203_v55, %v1127_v57 }
 0x469   : > { %v1277_v58 = vpop.f32.mrf.mxu1 }
 0x46a   : > { %v1286_v59 = vadd.f32 %v1277_v58, %v1122_v56 }
 0x46b   : > { %v1456_v62 = vpop.f32.mrf.mxu1 }
 0x46c   : > { %v1457_v63 = vadd.f32 %v1456_v62, %v1385_v60  ;;  %2208 = vmatprep.mubr.msk.f32.mxu0 %vm717_vm4, %v1286_v59 }
 0x46d   : > { %2209 = vmatmul.mubr.msk.f32.vlgmr.msra.gmra.mxu0 %vm717_vm4, %v1287_v61  ;;  %v2215_v1 = vpop.f32.mrf.mxu1 }
 0x46e   : > { %2226 = vmatprep.subr.msk.mxu1 %vm390_vm3, %v1457_v63  ;;  %2223 = vmatprep.mubr.msk.f32.mxu0 %vm383_vm2, %v2346_v6 }
 0x46f   : > { %v1528_v2 = vpop.f32.mrf.mxu1  ;;  %2227 = vmatpush3.msk.msra.mxu1 %vm390_vm3, %v1457_v63 }
 0x470   : > { %v1529_v3 = vadd.f32 %v1528_v2, %v1385_v60  ;;  %2229 = vmatmul.mubr.msk.f32.vlgmr.msra.gmra.mxu1 %vm383_vm2, %v2360_v12 }
 0x471   : > { %v2220_v4 = vpop.f32.mrf.mxu1  ;;  %2238 = vmatprep.mubr.msk.f32.mxu1 %vm383_vm2, %v2385_v18 }
 0x472   : > { %2221 = vmatprep.subr.msk.mxu0 %vm390_vm3, %v1529_v3 }
 0x473   : > { %2222 = vmatpush3.msk.msra.mxu0 %vm390_vm3, %v1529_v3 }
 0x474   : > { %2224 = vmatmul.mubr.msk.f32.vlgmr.msra.gmra.mxu0 %vm383_vm2, %v2369_v16  ;;  %2231 = vmatprep.subr.mxu0 %v2272_v0 }
 0x475   : > { %2232 = vmatpush3.msra.mxu0 %v2372_v17  ;;  %2233 = vmatprep.mubr.msk.f32.mxu0 %vm2273_vm0, %v2272_v0 }
 0x476   : > { %2241 = vmatprep.subr.msk.mxu0 %vm717_vm4, %v2395_v20 }
 0x478   : > { %2234 = vmatmul.mubr.msk.f32.vlgmr.msra.gmra.mxu0 %vm230_vm1, %v1380_v52 }
 0x479   : > { %2242 = vmatpush3.xpose.msk.msra.mxu0 %vm717_vm4, %v2395_v20 }
 0x47a   : > { %2243 = vmatprep.subr.msk.mxu0 %vm717_vm4, %v2431_v29 }
 0x47d   : > { %2244 = vmatpush3.xpose.msk.msra.mxu0 %vm717_vm4, %v2431_v29 }
 0x52d   : > { %v2210_v5 = vpop.f32.mrf.mxu0 }
 0x52e   : > { %2055 = vst.msk [vmem:[%s2468_s7 + $0x18] sm:$0xff] %vm805_vm5, %v2210_v5 }
 0x52f   : > { %v1368_v6 = vpop.f32.mrf.mxu0 }
 0x530   : > { %2054 = vst.msk [vmem:[%s2468_s7 + $0x10] sm:$0xff] %vm805_vm5, %v1368_v6  ;;  %v2230_v11 = vpop.f32.mrf.mxu1 }
 0x532   : > { %v1693_v12 = vpop.f32.mrf.mxu1 }
 0x534   : > { %v2225_v0 = vpop.f32.mrf.mxu0 }
 0x535   : > { %v1699_v15 = vadd.f32 %v2230_v11, %v2225_v0 }
 0x536   : > { %v1609_v7 = vpop.f32.mrf.mxu0 }
 0x537   : > { %v1694_v14 = vadd.f32 %v1693_v12, %v1609_v7 }
 0x538   : > { %v1768_v8 = vpop.f32.mrf.mxu0 }
 0x539   : > { %v1769_v9 = vadd.f32 %v1768_v8, %v1385_v60 }
 0x53a   : > { %v2235_v10 = vpop.f32.mrf.mxu0 }
 0x53b   : > { %2236 = vmatprep.subr.msk.mxu1 %vm390_vm3, %v1769_v9 }
 0x53c   : > { %2237 = vmatpush3.msk.msra.mxu1 %vm390_vm3, %v1769_v9 }
 0x53d   : > { %2239 = vmatmul.mubr.msk.f32.vlgmr.msra.gmra.mxu1 %vm383_vm2, %v2407_v27 }
 0x5fd   : > { %v2240_v13 = vpop.f32.mrf.mxu1 }
 0x5fe   : > { %v1859_v18 = vadd.f32 %v2240_v13, %v1699_v15 }
 0x5ff   : > { %v1849_v16 = vpop.f32.mrf.mxu1 }
 0x600   : > { %v1858_v17 = vadd.f32 %v1849_v16, %v1694_v14 }
 0x602   : > { %2245 = vmatprep.mubr.msk.f32.mxu0 %vm717_vm4, %v1858_v17 }
 0x603   : > { %2246 = vmatmul.mubr.msk.f32.vlgmr.msra.gmra.mxu0 %vm717_vm4, %v1859_v18 }
 0x6c3   : > { %v2247_v19 = vpop.f32.mrf.mxu0 }
 0x6c4   : > { %2077 = vst.msk [vmem:[%s2468_s7 + $0x28] sm:$0xff] %vm805_vm5, %v2247_v19 }
 0x6c5   : > { %v1940_v20 = vpop.f32.mrf.mxu0 }
 0x6c6   : > { %2076 = vst.msk [vmem:[%s2468_s7 + $0x20] sm:$0xff] %vm805_vm5, %v1940_v20 }
 0x6c7 PF: > { %s15_s18 = sadd.s32 1, %s2270_s18  }
 0x6c8   : > { %p12_p4 = scmp.ge.s32.totalorder %s15_s18, 4  }
 0x6ca   :  { %14 = sbr.rel (!%p12_p4) target bundleno = 1 (0x1), region = 74 }

// kernel: spectral_vit_forward.3
= control target key start
LH: loop header
LB: loop body
LE: loop exit
PB: predicated region body
PF: predicated region fallthrough
CT: control target
= control target key end

     0   :  { %s2921_s24 = smov 0   ;;  %s2923_s25 = smov 0   ;;  %s3313_s0 = inlined_call_operand.vmem [shape: f32[2,4,192], index: 0, kind: input, shape index: {}]   ;;  %s3314_s1 = inlined_call_operand.vmem [shape: bf16[192,128], index: 1, kind: input, shape index: {}]   ;;  %s3315_s2 = inlined_call_operand.vmem [shape: f32[1,128], index: 2, kind: input, shape index: {}]   ;;  %s3316_s3 = inlined_call_operand.vmem [shape: f32[1,128], index: 3, kind: input, shape index: {}]   ;;  %s3317_s4 = inlined_call_operand.vmem [shape: f32[8,128], index: 4, kind: input, shape index: {}]   ;;  %s3318_s5 = inlined_call_operand.vmem [shape: f32[2,1,128], index: 5, kind: input, shape index: {}]   ;;  %s3319_s6 = inlined_call_operand.vmem [shape: f32[2,1,128], index: 6, kind: input, shape index: {}]   ;;  %s3320_s7 = inlined_call_operand.vmem [shape: bf16[2,128,384], index: 7, kind: input, shape index: {}]   ;;  %s3321_s8 = inlined_call_operand.vmem [shape: f32[2,1,384], index: 8, kind: input, shape index: {}]   ;;  %s3322_s9 = inlined_call_operand.vmem [shape: bf16[2,128,128], index: 9, kind: input, shape index: {}]   ;;  %s3323_s10 = inlined_call_operand.vmem [shape: f32[2,1,128], index: 10, kind: input, shape index: {}]   ;;  %s3324_s11 = inlined_call_operand.vmem [shape: f32[2,1,128], index: 11, kind: input, shape index: {}]   ;;  %s3325_s12 = inlined_call_operand.vmem [shape: f32[2,1,128], index: 12, kind: input, shape index: {}]   ;;  %s3326_s13 = inlined_call_operand.vmem [shape: bf16[2,128,256], index: 13, kind: input, shape index: {}]   ;;  %s3327_s14 = inlined_call_operand.vmem [shape: f32[2,1,256], index: 14, kind: input, shape index: {}]   ;;  %s3328_s15 = inlined_call_operand.vmem [shape: bf16[2,256,128], index: 15, kind: input, shape index: {}]   ;;  %s3329_s16 = inlined_call_operand.vmem [shape: f32[2,1,128], index: 16, kind: input, shape index: {}]   ;;  %s3330_s17 = inlined_call_operand.vmem [shape: f32[2,8,128], index: 17, kind: output, shape index: {}]  }
   0x1   :  { %3336 = sst [smem:[#allocation8_spill]] %s3313_s0  ;;  %s2925_s26 = smov 0  }
   0x2   :  { %3337 = sst [smem:[#allocation9_spill]] %s3314_s1  ;;  %s2927_s27 = smov 0  }
   0x3   :  { %3338 = sst [smem:[#allocation10_spill]] %s3315_s2  ;;  %s2929_s28 = smov 0  }
   0x4   :  { %3339 = sst [smem:[#allocation11_spill]] %s3316_s3 }
   0x5   :  { %3340 = sst [smem:[#allocation12_spill]] %s3317_s4 }
   0x6   :  { %3341 = sst [smem:[#allocation13_spill]] %s3318_s5 }
   0x7   :  { %3342 = sst [smem:[#allocation14_spill]] %s3319_s6 }
   0x8   :  { %3343 = sst [smem:[#allocation15_spill]] %s3320_s7 }
   0x9   :  { %3344 = sst [smem:[#allocation16_spill]] %s3322_s9 }
   0xa LB: > { %3345 = sst [smem:[#allocation2_spill]] %s2806_s24  ;;  %s36_s29 = sadd.s32 1, %s2814_s26  ;;  %s2822_s28 = sphi %s2929_s28, %s27_s28   ;;  %s2818_s27 = sphi %s2927_s27, %s3372_s27   ;;  %s2814_s26 = sphi %s2925_s26, %s3371_s26   ;;  %s2810_s25 = sphi %s2923_s25, %s3370_s25   ;;  %s2806_s24 = sphi %s2921_s24, %s3369_s24  }
   0xb   : > { %3346 = sst [smem:[#allocation3_spill]] %s2814_s26  ;;  %s39_s0 = sadd.s32 1, %s2818_s27 }
   0xc   : > { %3347 = sst [smem:[#allocation4_spill]] %s2818_s27  ;;  %p37_p0 = scmp.ge.s32.totalorder %s36_s29, 2 }
   0xd   : > { %3348 = sst [smem:[#allocation5_spill]] %s2822_s28  ;;  %p2363_p1 = scmp.ge.s32.totalorder %s2822_s28, 1 }
   0xe   : > { %p605_p2 = scmp.lt.s32.totalorder %s2822_s28, 5  ;;  %s3374_s29 = smov (%p37_p0, %s36_s29), 0 }
   0xf   : > { %3349 = sst [smem:[#allocation6_spill]] %s3374_s29  ;;  %s3376_s0 = smov (!%p37_p0, %s39_s0), %s2818_s27 }
  0x10   : > { %p606_p3 = pnand %p2363_p1, %p605_p2  ;;  %p41_p4 = scmp.ge.s32.totalorder %s3376_s0, 2 }
  0x11   : > { %p702_p5 = scmp.lt.s32.totalorder (!%p606_p3), %s2810_s25, 1  ;;  %p707_p6 = scmp.lt.s32.totalorder (!%p606_p3), %s2806_s24, 1 }
  0x12   : > { %s3378_s0 = smov (%p41_p4, %s3376_s0), 0  ;;  %609 = sbr.rel (%p606_p3) target bundleno = 3099 (0xc1b), region = 88 }
  0x13   : > { %3350 = sst [smem:[#allocation7_spill]] %s3378_s0 }
  0x14   : > { %s3351_s20 = sld [smem:[#allocation8_spill]] (!%p606_p3) }
  0x15   : > { %s3354_s7 = sld [smem:[#allocation15_spill]] (!%p606_p3) }
  0x16   : > { %s3355_s9 = sld [smem:[#allocation16_spill]] (!%p606_p3) }
  0x17   : > { %s3380_s25 = smov (!%p702_p5, %s2810_s25), 1  ;;  %s3356_s1 = sld [smem:[#allocation2_spill]] }
  0x18   : > { %s2955_s30 = scalar_select %p707_p6, %s2806_s24, 1 }
  0x19   : > { %s2470_s18 = sshll.u32 %s3380_s25, 3 }
  0x1a   : > { %s2960_s21 = scalar_lea.vmem %s3351_s20, %s2470_s18  ;;  %s2618_s28 = smul.u32 192, %s2955_s30 }
  0x1b   : > { %s2619_s4 = smul.u32 3, %s2955_s30  ;;  %s2471_s3 = sshll.u32 %s2955_s30, 6 }
  0x1c   : > { %s2976_s25 = scalar_lea.vmem %s3354_s7, %s2618_s28  ;;  %s2981_s20 = scalar_lea.vmem %s3355_s9, %s2471_s3 }
  0x1d   : > { %s2986_s0 = scalar_lea.vmem %s3321_s8, %s2619_s4  ;;  %s2472_s19 = sshll.u32 %s2955_s30, 7 }
  0x1e   : > { %s2371_s3 = sshll.u32 %s2955_s30, 1  ;;  %s3005_s22 = scalar_lea.vmem %s3326_s13, %s2472_s19 }
  0x1f   : > { %s3010_s27 = scalar_lea.vmem %s3327_s14, %s2371_s3  ;;  %s3015_s5 = scalar_lea.vmem %s3328_s15, %s2472_s19 }
  0x20   : > { %s752_s28 = scalar_lea.vmem %s3329_s16, %s2955_s30  ;;  %s3024_s9 = scalar_lea.vmem %s3330_s17, %s2470_s18 }
  0x21   : > { %p2375_p7 = scmp.ne.s32.totalorder %s3356_s1, 0 }
  0x22   : > { %s3357_s23 = sld [smem:[#allocation9_spill]] (!%p2375_p7) }
  0x23   : > { %761 = sbr.rel (%p2375_p7) target bundleno = 291 (0x123), region = 92  ;;  %s3359_s18 = sld [smem:[#allocation11_spill]] (!%p2375_p7) }
  0x24   : > { %s3360_s6 = sld [smem:[#allocation12_spill]] (!%p2375_p7) }
  0x28   : > { %v2667_v0 = vld [vmem:[%s3357_s23 + $0x38] sm:$0xff]   ;;  %v2824_v1 = vmov 0   ;;  %v2668_v2 = vld [vmem:[%s3357_s23 + $0x30] sm:$0xff]   ;;  %v2669_v3 = vld [vmem:[%s3357_s23 + $0x28] sm:$0xff]   ;;  %vm871_vm0 = vcmask 523264   ;;  %vm919_vm1 = vcmask 1040384  }
  0x29   : > { %875 = vmatprep.subr.bf16.mxu0 %v2824_v1  ;;  %v2670_v4 = vld [vmem:[%s3357_s23 + $0x20] sm:$0xff]   ;;  %v2671_v7 = vld [vmem:[%s3357_s23 + $0x18] sm:$0xff]   ;;  %v2672_v9 = vld [vmem:[%s3357_s23 + $0x10] sm:$0xff]   ;;  %vm921_vm2 = vcmask 1044480  }
  0x2a   : > { %876 = vmatpush1.bf16.msra.mxu0 %v2667_v0  ;;  %v762_v5 = vld [vmem:[%s2960_s21] sm:$0xff]  ;;  %v2673_v10 = vld [vmem:[%s3357_s23 + $0x8] sm:$0xff]   ;;  %v2675_v12 = vld [vmem:[%s3357_s23 + $0x58] sm:$0xff]   ;;  %s3358_s21 = sld [smem:[#allocation10_spill]] }
  0x2b   : > { %877 = vmatprep.subr.bf16.mxu0 %v2824_v1  ;;  %v764_v6 = vcombine.high %v762_v5, %v762_v5  ;;  %v2674_v11 = vld [vmem:[%s3357_s23] sm:$0xff]   ;;  %v2676_v13 = vld [vmem:[%s3357_s23 + $0x50] sm:$0xff]   ;;  %v2677_v14 = vld [vmem:[%s3357_s23 + $0x48] sm:$0xff]   ;;  %v766_v16 = vpack.c.bf16 %v762_v5, %v762_v5 }
  0x2c   : > { %v2678_v15 = vld [vmem:[%s3357_s23 + $0x40] sm:$0xff]  }
  0x2d   : > { %v767_v8 = vpack.c.bf16 %v764_v6, %v764_v6  ;;  %v915_v20 = vld [vmem:[%s3359_s18] sm:$0x1] }
  0x2e   : > { %878 = vmatpush1.bf16.msra.mxu0 %v2668_v2  ;;  %v923_v23 = vld [vmem:[%s3360_s6] sm:$0xff] }
  0x2f   : > { %879 = vmatprep.subr.bf16.mxu0 %v2824_v1  ;;  %2389 = vmatprep.mubr.msk.bf16.mxu0 %vm871_vm0, %v767_v8 }
  0x30   : > { %v2376_v17 = vld [vmem:[%s3358_s21] ss:$0 sm:$0xff] }
  0x32   : > { %880 = vmatpush1.bf16.msra.mxu0 %v2669_v3 }
  0x33   : > { %881 = vmatprep.subr.bf16.mxu0 %v2824_v1 }
  0x36   : > { %882 = vmatpush1.bf16.msra.mxu0 %v2670_v4 }
  0x37   : > { %883 = vmatprep.subr.bf16.mxu0 %v2824_v1 }
  0x3a   : > { %884 = vmatpush1.bf16.msra.mxu0 %v2671_v7 }
  0x3b   : > { %885 = vmatprep.subr.bf16.mxu0 %v2824_v1 }
  0x3e   : > { %886 = vmatpush1.bf16.msra.mxu0 %v2672_v9 }
  0x3f   : > { %887 = vmatprep.subr.bf16.mxu0 %v2824_v1 }
  0x42   : > { %888 = vmatpush1.bf16.msra.mxu0 %v2673_v10 }
  0x43   : > { %889 = vmatprep.subr.bf16.mxu0 %v2824_v1 }
  0x46   : > { %890 = vmatpush1.bf16.msra.mxu0 %v2674_v11 }
  0x47   : > { %899 = vmatprep.subr.bf16.mxu0 %v2824_v1 }
  0x4a   : > { %900 = vmatpush2.bf16.msra.mxu0 %v2675_v12 }
  0x4b   : > { %901 = vmatprep.subr.bf16.mxu0 %v2824_v1 }
  0x4e   : > { %902 = vmatpush2.bf16.msra.mxu0 %v2676_v13 }
  0x4f   : > { %903 = vmatprep.subr.bf16.mxu0 %v2824_v1 }
  0x52   : > { %904 = vmatpush2.bf16.msra.mxu0 %v2677_v14 }
  0x53   : > { %905 = vmatprep.subr.bf16.mxu0 %v2824_v1 }
  0x56   : > { %906 = vmatpush2.bf16.msra.mxu0 %v2678_v15 }
  0x59   : > { %908 = vmatmul.mubr.bf16.vlgmr.msra.gmra.mxu0 %v766_v16 }
 0x119   : > { %v909_v18 = vpop.f32.mrf.mxu0 }
 0x11a   : > { %v910_v19 = vadd.f32 %v2376_v17, %v909_v18 }
 0x11b   : > { %v911_v21 = vpop.f32.mrf.mxu0 }
 0x11c   : > { %v917_v22 = vrot.slane %v910_v19, 7 }
 0x11d   : > { %v912_v24 = vpop.f32.mrf.mxu0 }
 0x11e   : > { %v920_v25 = vsel %vm919_vm1, %v915_v20, %v917_v22 }
 0x11f   : > { %v922_v26 = vsel %vm921_vm2, %v920_v25, 0.0  ;;  %v913_v27 = vpop.f32.mrf.mxu0 }
 0x120   : > { %v924_v28 = vadd.f32 %v923_v23, %v922_v26 }
 0x122   : > { %925 = vst [vmem:[%s3024_s9] sm:$0xff] %v924_v28 }
 0x123 PF: > { %v2680_v30 = vld [vmem:[%s2976_s25 + $0xac] ss:$12 sps:$4 sm:$0xff]   ;;  %v2682_v31 = vld [vmem:[%s2976_s25 + $0xa8] ss:$12 sps:$4 sm:$0xff]   ;;  %v2825_v32 = vmov 0.0   ;;  %v2826_v51 = vmov 0   ;;  %v990_v6 = vlaneseq  ;;  %s3365_s29 = scalar_lea.vmem %s3323_s10, %s2955_s30  ;;  %s3366_s1 = scalar_lea.vmem %s3324_s11, %s2955_s30 }
 0x124   : > { %2530 = vmatprep.subr.bf16.mxu1 %v2825_v32  ;;  %v2683_v33 = vld [vmem:[%s2976_s25 + $0xb0] ss:$12 sps:$4 sm:$0xff]   ;;  %v2684_v34 = vld [vmem:[%s2976_s25 + $0x94] ss:$12 sps:$4 sm:$0xff]   ;;  %1133 = vmatprep.subr.bf16.mxu0 %v2680_v30  ;;  %v2687_v36 = vld [vmem:[%s2976_s25 + $0x98] ss:$12 sps:$4 sm:$0xff]  }
 0x125   : > { %v2686_v35 = vld [vmem:[%s2976_s25 + $0x90] ss:$12 sps:$4 sm:$0xff]   ;;  %1134 = vmatpush1.bf16.msra.mxu0 %v2682_v31  ;;  %2531 = vmatpush3.bf16.msra.mxu1 %v2683_v33  ;;  %v2690_v42 = vld [vmem:[%s2976_s25 + $0x78] ss:$12 sps:$4 sm:$0xff]   ;;  %v2691_v43 = vld [vmem:[%s2976_s25 + $0x80] ss:$12 sps:$4 sm:$0xff]  }
 0x126   : > { %1135 = vmatprep.subr.bf16.mxu0 %v2684_v34  ;;  %2532 = vmatprep.subr.bf16.mxu1 %v2825_v32  ;;  %v2688_v41 = vld [vmem:[%s2976_s25 + $0x7c] ss:$12 sps:$4 sm:$0xff]   ;;  %v2692_v44 = vld [vmem:[%s2976_s25 + $0x64] ss:$12 sps:$4 sm:$0xff]   ;;  %v2694_v45 = vld [vmem:[%s2976_s25 + $0x60] ss:$12 sps:$4 sm:$0xff]  }
 0x127   : > { %v2695_v46 = vld [vmem:[%s2976_s25 + $0x68] ss:$12 sps:$4 sm:$0xff]   ;;  %v2696_v47 = vld [vmem:[%s2976_s25 + $0x4c] ss:$12 sps:$4 sm:$0xff]   ;;  %v2699_v49 = vld [vmem:[%s2976_s25 + $0x50] ss:$12 sps:$4 sm:$0xff]   ;;  %1165 = vmatprep.mubr.bf16.mxu0 %v2826_v51 }
 0x128   : > { %v2698_v48 = vld [vmem:[%s2976_s25 + $0x48] ss:$12 sps:$4 sm:$0xff]   ;;  %vm2827_vm3 = vmmov 0   ;;  %v2702_v52 = vld [vmem:[%s2976_s25 + $0x30] ss:$12 sps:$4 sm:$0xff]   ;;  %s3361_s4 = sld [smem:[#allocation13_spill]] }
 0x129   : > { %v3075_v29 = vld [vmem:[%s3024_s9] sm:$0xff]  ;;  %1136 = vmatpush1.bf16.msra.mxu0 %v2686_v35  ;;  %2533 = vmatpush3.bf16.msra.mxu1 %v2687_v36  ;;  %v2704_v54 = vld [vmem:[%s2976_s25 + $0x1c] ss:$12 sps:$4 sm:$0xff]   ;;  %s3363_s21 = sld [smem:[#allocation14_spill]]  ;;  %v3130_v7 = vshrl.u32 %v990_v6, 7  ;;  %vm1220_vm4 = vcmask 261120  }
 0x12a   : > { %929 = vadd.xlane.f32.xlu0 %v3075_v29  ;;  %2534 = vmatprep.subr.bf16.mxu1 %v2825_v32  ;;  %v2700_v50 = vld [vmem:[%s2976_s25 + $0x34] ss:$12 sps:$4 sm:$0xff]   ;;  %v2703_v53 = vld [vmem:[%s2976_s25 + $0x38] ss:$12 sps:$4 sm:$0xff]   ;;  %s2829_s7 = smov 32   ;;  %vm1285_vm5 = vcmask 1043456  }
 0x12b   : > { %1137 = vmatprep.subr.bf16.mxu0 %v2688_v41  ;;  %2546 = vmatprep.mubr.msk.bf16.mxu1 %vm2827_vm3, %v2825_v32  ;;  %v2706_v55 = vld [vmem:[%s2976_s25 + $0x18] ss:$12 sps:$4 sm:$0xff]   ;;  %v2707_v56 = vld [vmem:[%s2976_s25 + $0x20] ss:$12 sps:$4 sm:$0xff]   ;;  %v2711_v59 = vld [vmem:[%s2976_s25 + $0x8] ss:$12 sps:$4 sm:$0xff]  }
 0x12c   : > { %v2708_v57 = vld [vmem:[%s2976_s25 + $0x4] ss:$12 sps:$4 sm:$0xff]   ;;  %v2710_v58 = vld [vmem:[%s2976_s25] ss:$12 sps:$4 sm:$0xff]   ;;  %v996_v8 = vsub.s32 1, %v3130_v7  ;;  %v992_v9 = vsub.s32 0, %v3130_v7 }
 0x12d   : > { %1138 = vmatpush1.bf16.msra.mxu0 %v2690_v42  ;;  %2535 = vmatpush3.bf16.msra.mxu1 %v2691_v43  ;;  %v988_v10 = vld [vmem:[%s2986_s0] sm:$0x7]  ;;  %v1000_v11 = vsub.s32 2, %v3130_v7  ;;  %s2828_s0 = smov 96   ;;  %v3152_v34 = vand.u32 127, %v990_v6  ;;  %vm1268_vm7 = vcmask 64512  }
 0x12e   : > { %2536 = vmatprep.subr.bf16.mxu1 %v2825_v32  ;;  %1139 = vmatprep.subr.bf16.mxu0 %v2692_v44  ;;  %s3362_s3 = scalar_lea.vmem %s3361_s4, %s2955_s30  ;;  %v997_v12 = vrot.slane %v988_v10, %v996_v8  ;;  %v993_v15 = vrot.slane %v988_v10, %v992_v9  ;;  %s2830_s18 = smov 64   ;;  %vm1678_vm8 = vcmask 523264   ;;  %vm1680_vm9 = vcmask 785408  }
 0x12f   : > { %v2390_v0 = vld [vmem:[%s3362_s3] ss:$0 sm:$0xff]  ;;  %s3364_s19 = scalar_lea.vmem %s3363_s21, %s2955_s30  ;;  %v1001_v18 = vrot.slane %v988_v10, %v1000_v11  ;;  %vm1216_vm6 = vcmp.ge.s32.totalorder %v3152_v34, 5  ;;  %s3367_s3 = scalar_lea.vmem %s3325_s12, %s2955_s30 }
 0x130   : > { %v2391_v2 = vld [vmem:[%s3364_s19] ss:$0 sm:$0xff] }
 0x131   : > { %1140 = vmatpush1.bf16.msra.mxu0 %v2694_v45  ;;  %2537 = vmatpush3.bf16.msra.mxu1 %v2695_v46 }
 0x132   : > { %1141 = vmatprep.subr.bf16.mxu0 %v2696_v47  ;;  %2538 = vmatprep.subr.bf16.mxu1 %v2825_v32 }
 0x135   : > { %1142 = vmatpush1.bf16.msra.mxu0 %v2698_v48  ;;  %2539 = vmatpush3.bf16.msra.mxu1 %v2699_v49 }
 0x136   : > { %1143 = vmatprep.subr.bf16.mxu0 %v2700_v50  ;;  %2540 = vmatprep.subr.bf16.mxu1 %v2825_v32 }
 0x139   : > { %1144 = vmatpush1.bf16.msra.mxu0 %v2702_v52  ;;  %2541 = vmatpush3.bf16.msra.mxu1 %v2703_v53 }
 0x13a   : > { %1145 = vmatprep.subr.bf16.mxu0 %v2704_v54  ;;  %2542 = vmatprep.subr.bf16.mxu1 %v2825_v32 }
 0x13d   : > { %1146 = vmatpush1.bf16.msra.mxu0 %v2706_v55  ;;  %2543 = vmatpush3.bf16.msra.mxu1 %v2707_v56 }
 0x13e   : > { %1147 = vmatprep.subr.bf16.mxu0 %v2708_v57  ;;  %2544 = vmatprep.subr.bf16.mxu1 %v2825_v32 }
 0x141   : > { %1148 = vmatpush1.bf16.msra.mxu0 %v2710_v58  ;;  %2545 = vmatpush3.bf16.msra.mxu1 %v2711_v59 }
 0x142   : > { %2550 = vmatprep.subr.bf16.mxu1 %v2825_v32  ;;  %2574 = vmatprep.subr.bf16.mxu0 %v2825_v32 }
 0x1b3   : > { %v930_v37 = vpop.xlane.xlu0 %929 }
 0x1b4   : > { %v932_v38 = vmul.f32 0.0078125, %v930_v37 }
 0x1b6   : > { %v933_v39 = vsub.f32 %v3075_v29, %v932_v38 }
 0x1b8   : > { %v934_v40 = vmul.f32 %v933_v39, %v933_v39 }
 0x1ba   : > { %935 = vadd.xlane.f32.xlu0 %v934_v40 }
 0x243   : > { %v936_v60 = vpop.xlane.xlu0 %935 }
 0x244   : > { %v937_v61 = vmul.f32 0.0078125, %v936_v60 }
 0x246   : > { %v938_v62 = vadd.f32 1e-06, %v937_v61 }
 0x248   : > { %2760 = vrsqrt.f32 %v938_v62 }
 0x255   : > { %v2761_v63 = vpop.eup %2760 }
 0x256   : > { %v940_v1 = vmul.f32 %v2761_v63, %v933_v39 }
 0x258   : > { %v947_v3 = vmul.f32 %v2390_v0, %v940_v1 }
 0x25a   : > { %v954_v4 = vadd.f32 %v2391_v2, %v947_v3 }
 0x25c   : > { %v955_v5 = vpack.c.bf16 %v954_v4, %v954_v4 }
 0x25e   : > { %1166 = vmatmul.mubr.bf16.vlgmr.msra.gmra.mxu0 %v955_v5  ;;  %2547 = vmatmul.mubr.bf16.vlgmr.msra.gmra.mxu1 %v955_v5 }
 0x25f   : > { %2552 = vmatprep.mubr.msk.bf16.mxu1 %vm2827_vm3, %v2825_v32  ;;  %2576 = vmatprep.mubr.msk.bf16.mxu0 %vm2827_vm3, %v2825_v32 }
 0x31e   : > { %v1167_v13 = vpop.f32.mrf.mxu0  ;;  %v1208_v14 = vpop.f32.mrf.mxu1 }
 0x31f   : > { %v1168_v22 = vadd.f32 %v1167_v13, %v993_v15  ;;  %v1209_v26 = vadd.f32 %v1208_v14, %v1001_v18 }
 0x320   : > { %v1169_v16 = vpop.f32.mrf.mxu0  ;;  %v2548_v17 = vpop.f32.mrf.mxu1 }
 0x321   : > { %v1170_v19 = vadd.f32 %v1169_v16, %v997_v12  ;;  %v1217_v28 = vmul.f32 0.17677669, %v1168_v22  ;;  %v3143_v30 = vpack.c.bf16 %v1209_v26, %v1209_v26 }
 0x322   : > { %v1171_v20 = vpop.f32.mrf.mxu0  ;;  %v1211_v21 = vpop.f32.mrf.mxu1 }
 0x323   : > { %v1219_v23 = vpack.c.bf16 %v1170_v19, %v1170_v19  ;;  %v1218_v31 = vpack.c.bf16 %v1217_v28, %v1217_v28  ;;  %v1287_v33 = vsel %vm1285_vm5, %v3143_v30, 0 }
 0x324   : > { %v1172_v24 = vpop.f32.mrf.mxu0  ;;  %v2549_v25 = vpop.f32.mrf.mxu1 }
 0x325   : > { %1333 = vrot.lane.b32.xlu0 %v1219_v23, %s2828_s0  ;;  %v1225_v27 = vsel %vm1220_vm4, %v1219_v23, 0 }
 0x326   : > { %2551 = vmatpush3.bf16.xpose.msra.mxu1 %v1225_v27 }
 0x327   : > { %2556 = vmatprep.subr.bf16.mxu1 %v2825_v32 }
 0x329   : > { %1556 = vrot.lane.b32.xlu0 %v1219_v23, %s2829_s7 }
 0x32d   : > { %2553 = vmatmul.mubr.msk.bf16.vlgmr.msra.gmra.mxu1 %vm1220_vm4, %v1218_v31 }
 0x32e   : > { %2557 = vmatpush3.bf16.msra.mxu1 %v1287_v33  ;;  %2558 = vmatprep.mubr.msk.bf16.mxu1 %vm2827_vm3, %v2825_v32 }
 0x32f   : > { %2562 = vmatprep.subr.bf16.mxu1 %v2825_v32 }
 0x397   : > { %v1334_v48 = vpop.permute.xlu0 %1333 }
 0x398   : > { %v1339_v58 = vsel %vm1220_vm4, %v1334_v48, 0 }
 0x39b   : > { %v1557_v53 = vpop.permute.xlu0 %1556 }
 0x39c   : > { %v1562_v56 = vsel %vm1220_vm4, %v1557_v53, 0 }
 0x3ed   : > { %v1261_v35 = vpop.f32.mrf.mxu1 }
 0x3ee   : > { %v1267_v36 = vsel %vm1216_vm6, -1e+30, %v1261_v35 }
 0x3ef   : > { %v2554_v37 = vpop.f32.mrf.mxu1  ;;  %v1269_v38 = vsel %vm1268_vm7, %v1267_v36, -inf }
 0x3f0   : > { %1270 = vmax.xlane.f32.xlu1 %v1269_v38 }
 0x3f1   : > { %v1264_v39 = vpop.f32.mrf.mxu1 }
 0x3f3   : > { %v2555_v40 = vpop.f32.mrf.mxu1 }
 0x479   : > { %v1271_v41 = vpop.xlane.xlu1 %1270 }
 0x47a   : > { %v1272_v42 = vsub.f32 %v1267_v36, %v1271_v41 }
 0x47c   : > { %v1273_v43 = vmul.f32 1.442695, %v1272_v42 }
 0x47e   : > { %2762 = vpow2.f32 %v1273_v43 }
 0x48b   : > { %v2763_v44 = vpop.eup %2762 }
 0x48c   : > { %v1275_v45 = vsel %vm1268_vm7, %v2763_v44, 0.0 }
 0x48d   : > { %1276 = vadd.xlane.f32.xlu1 %v1275_v45 }
 0x49e   : > { %1330 = vrot.lane.b32.xlu1 %v1218_v31, %s2828_s0 }
 0x4a2   : > { %1445 = vrot.lane.b32.xlu1 %v1219_v23, %s2830_s18 }
 0x4a6   : > { %1443 = vrot.lane.b32.xlu1 %v1218_v31, %s2830_s18 }
 0x4aa   : > { %1554 = vrot.lane.b32.xlu1 %v1218_v31, %s2829_s7 }
 0x516   : > { %v1277_v46 = vpop.xlane.xlu1 %1276 }
 0x517   : > { %2764 = vrcp.f32 %v1277_v46 }
 0x51a   : > { %v1331_v47 = vpop.permute.xlu1 %1330 }
 0x51e   : > { %v1446_v49 = vpop.permute.xlu1 %1445 }
 0x51f   : > { %v1451_v50 = vsel %vm1220_vm4, %v1446_v49, 0 }
 0x520   : > { %2575 = vmatpush3.bf16.xpose.msra.mxu0 %v1451_v50 }
 0x521   : > { %2586 = vmatprep.subr.bf16.mxu0 %v2825_v32 }
 0x522   : > { %v1444_v55 = vpop.permute.xlu1 %1443 }
 0x524   : > { %v2765_v52 = vpop.eup %2764 }
 0x525   : > { %v1279_v54 = vmul.f32 %v2765_v52, %v2763_v44 }
 0x526   : > { %v1555_v59 = vpop.permute.xlu1 %1554 }
 0x527   : > { %2577 = vmatmul.mubr.msk.bf16.vlgmr.msra.gmra.mxu0 %vm1220_vm4, %v1444_v55  ;;  %v1280_v57 = vpack.c.bf16 %v1279_v54, %v1279_v54 }
 0x528   : > { %2587 = vmatpush3.bf16.xpose.msra.mxu0 %v1562_v56  ;;  %2588 = vmatprep.mubr.msk.bf16.mxu0 %vm2827_vm3, %v2825_v32 }
 0x529   : > { %2559 = vmatmul.mubr.msk.bf16.vlgmr.msra.gmra.mxu1 %vm1268_vm7, %v1280_v57  ;;  %2598 = vmatprep.subr.bf16.mxu0 %v2825_v32  ;;  %v2712_v57 = vld [vmem:[%s2981_s20 + $0x38] sm:$0xff]  }
 0x52a   : > { %2563 = vmatpush3.bf16.xpose.msra.mxu1 %v1339_v58  ;;  %2564 = vmatprep.mubr.msk.bf16.mxu1 %vm2827_vm3, %v2825_v32  ;;  %v2713_v58 = vld [vmem:[%s2981_s20 + $0x30] sm:$0xff]  }
 0x52b   : > { %2568 = vmatprep.subr.bf16.mxu1 %v2825_v32 }
 0x52f   : > { %2589 = vmatmul.mubr.msk.bf16.vlgmr.msra.gmra.mxu0 %vm1220_vm4, %v1555_v59  ;;  %v2714_v59 = vld [vmem:[%s2981_s20 + $0x28] sm:$0xff]  }
 0x530   : > { %2614 = vmatprep.mubr.msk.bf16.mxu0 %vm2827_vm3, %v2825_v32  ;;  %2599 = vmatpush3.bf16.msra.mxu0 %v2712_v57 }
 0x531   : > { %2565 = vmatmul.mubr.msk.bf16.vlgmr.msra.gmra.mxu1 %vm1220_vm4, %v1331_v47  ;;  %2600 = vmatprep.subr.bf16.mxu0 %v2825_v32 }
 0x532   : > { %2570 = vmatprep.mubr.msk.bf16.mxu1 %vm2827_vm3, %v2825_v32 }
 0x534   : > { %2601 = vmatpush3.bf16.msra.mxu0 %v2713_v58 }
 0x535   : > { %2602 = vmatprep.subr.bf16.mxu0 %v2825_v32 }
 0x538   : > { %2603 = vmatpush3.bf16.msra.mxu0 %v2714_v59 }
 0x539   : > { %2604 = vmatprep.subr.bf16.mxu0 %v2825_v32 }
 0x5e7   : > { %v1487_v60 = vpop.f32.mrf.mxu0 }
 0x5e8   : > { %v1493_v61 = vsel %vm1216_vm6, -1e+30, %v1487_v60  ;;  %v2715_v60 = vld [vmem:[%s2981_s20 + $0x20] sm:$0xff]  }
 0x5e9   : > { %v3183_v62 = vpop.f32.mrf.mxu1  ;;  %v2578_v63 = vpop.f32.mrf.mxu0  ;;  %v1494_v0 = vsel %vm1268_vm7, %v1493_v61, -inf  ;;  %2605 = vmatpush3.bf16.msra.mxu0 %v2715_v60  ;;  %v2744_v60 = vld [vmem:[%s3015_s5 + $0x78] sm:$0xff]  }
 0x5ea   : > { %1495 = vmax.xlane.f32.xlu1 %v1494_v0  ;;  %2606 = vmatprep.subr.bf16.mxu0 %v2825_v32  ;;  %v2718_v63 = vld [vmem:[%s2981_s20 + $0x8] sm:$0xff]  }
 0x5eb   : > { %v2560_v1 = vpop.f32.mrf.mxu1  ;;  %v1490_v2 = vpop.f32.mrf.mxu0 }
 0x5ec   : > { %v2719_v2 = vld [vmem:[%s2981_s20] sm:$0xff]  }
 0x5ed   : > { %v1326_v3 = vpop.f32.mrf.mxu1  ;;  %v2579_v4 = vpop.f32.mrf.mxu0 }
 0x5ef   : > { %v2561_v5 = vpop.f32.mrf.mxu1  ;;  %v1598_v6 = vpop.f32.mrf.mxu0 }
 0x5f0   : > { %v1604_v16 = vsel %vm1216_vm6, -1e+30, %v1598_v6 }
 0x5f1   : > { %v1375_v10 = vpop.f32.mrf.mxu1  ;;  %v2590_v11 = vpop.f32.mrf.mxu0  ;;  %v1605_v20 = vsel %vm1268_vm7, %v1604_v16, -inf }
 0x5f2   : > { %v1381_v12 = vsel %vm1216_vm6, -1e+30, %v1375_v10 }
 0x5f3   : > { %v2566_v13 = vpop.f32.mrf.mxu1  ;;  %v1601_v14 = vpop.f32.mrf.mxu0  ;;  %v1382_v15 = vsel %vm1268_vm7, %v1381_v12, -inf }
 0x5f4   : > { %1383 = vmax.xlane.f32.xlu0 %v1382_v15 }
 0x5f5   : > { %v1378_v17 = vpop.f32.mrf.mxu1  ;;  %v2591_v18 = vpop.f32.mrf.mxu0 }
 0x5f7   : > { %v2567_v19 = vpop.f32.mrf.mxu1 }
 0x5f8   : > { %1606 = vmax.xlane.f32.xlu0 %v1605_v20 }
 0x673   : > { %v1496_v21 = vpop.xlane.xlu1 %1495 }
 0x674   : > { %v1497_v22 = vsub.f32 %v1493_v61, %v1496_v21  ;;  %v2716_v61 = vld [vmem:[%s2981_s20 + $0x18] sm:$0xff]  }
 0x675   : > { %2607 = vmatpush3.bf16.msra.mxu0 %v2716_v61  ;;  %v2745_v61 = vld [vmem:[%s3015_s5 + $0x38] sm:$0xff]  }
 0x676   : > { %v1498_v23 = vmul.f32 1.442695, %v1497_v22  ;;  %2608 = vmatprep.subr.bf16.mxu0 %v2825_v32  ;;  %v2424_v22 = vld [vmem:[%s3365_s29] ss:$0 sm:$0xff] }
 0x678   : > { %2766 = vpow2.f32 %v1498_v23 }
 0x67d   : > { %v1384_v24 = vpop.xlane.xlu0 %1383 }
 0x67e   : > { %v1385_v25 = vsub.f32 %v1381_v12, %v1384_v24 }
 0x680   : > { %v1386_v26 = vmul.f32 1.442695, %v1385_v25 }
 0x681   : > { %v1607_v27 = vpop.xlane.xlu0 %1606 }
 0x682   : > { %2768 = vpow2.f32 %v1386_v26  ;;  %v1608_v28 = vsub.f32 %v1604_v16, %v1607_v27 }
 0x684   : > { %v1609_v31 = vmul.f32 1.442695, %v1608_v28  ;;  %v2720_v28 = vld [vmem:[%s3005_s22 + $0x70] ss:$8 sps:$4 sm:$0xff]  }
 0x685   : > { %v2767_v33 = vpop.eup %2766 }
 0x686   : > { %2770 = vpow2.f32 %v1609_v31  ;;  %v1500_v34 = vsel %vm1268_vm7, %v2767_v33, 0.0  ;;  %v2722_v31 = vld [vmem:[%s3005_s22 + $0x74] ss:$8 sps:$4 sm:$0xff]  }
 0x687   : > { %1501 = vadd.xlane.f32.xlu0 %v1500_v34  ;;  %v2723_v34 = vld [vmem:[%s3005_s22 + $0x60] ss:$8 sps:$4 sm:$0xff]  }
 0x68f   : > { %v2769_v35 = vpop.eup %2768 }
 0x690   : > { %v1388_v36 = vsel %vm1268_vm7, %v2769_v35, 0.0 }
 0x691   : > { %1389 = vadd.xlane.f32.xlu0 %v1388_v36 }
 0x693   : > { %v2771_v37 = vpop.eup %2770 }
 0x694   : > { %v1611_v38 = vsel %vm1268_vm7, %v2771_v37, 0.0 }
 0x695   : > { %1612 = vadd.xlane.f32.xlu1 %v1611_v38  ;;  %v2728_v38 = vld [vmem:[%s3005_s22 + $0x54] ss:$8 sps:$4 sm:$0xff]  }
 0x6a6   : > { %1506 = vrot.lane.b32.xlu1 %v3143_v30, %s2830_s18 }
 0x6a7   : > { %1395 = vrot.lane.b32.xlu0 %v3143_v30, %s2828_s0 }
 0x6aa   : > { %1617 = vrot.lane.b32.xlu1 %v3143_v30, %s2829_s7 }
 0x710   : > { %v1502_v39 = vpop.xlane.xlu0 %1501 }
 0x71a   : > { %v1390_v40 = vpop.xlane.xlu0 %1389 }
 0x71b   : > { %2772 = vrcp.f32 %v1390_v40  ;;  %v2729_v40 = vld [vmem:[%s3005_s22 + $0x40] ss:$8 sps:$4 sm:$0xff]  }
 0x71c   : > { %2774 = vrcp.f32 %v1502_v39  ;;  %v2726_v39 = vld [vmem:[%s3005_s22 + $0x50] ss:$8 sps:$4 sm:$0xff]  }
 0x71e   : > { %v1396_v41 = vpop.permute.xlu0 %1395  ;;  %v1613_v43 = vpop.xlane.xlu1 %1612 }
 0x71f   : > { %v1401_v42 = vsel %vm1285_vm5, %v1396_v41, 0  ;;  %2776 = vrcp.f32 %v1613_v43  ;;  %v2731_v41 = vld [vmem:[%s3005_s22 + $0x44] ss:$8 sps:$4 sm:$0xff]   ;;  %v2732_v43 = vld [vmem:[%s3005_s22 + $0x30] ss:$8 sps:$4 sm:$0xff]  }
 0x720   : > { %2569 = vmatpush3.bf16.msra.mxu1 %v1401_v42  ;;  %v2734_v42 = vld [vmem:[%s3005_s22 + $0x34] ss:$8 sps:$4 sm:$0xff]  }
 0x721   : > { %2580 = vmatprep.subr.bf16.mxu1 %v2825_v32 }
 0x722   : > { %v1507_v46 = vpop.permute.xlu1 %1506 }
 0x723   : > { %v1512_v49 = vsel %vm1285_vm5, %v1507_v46, 0  ;;  %v2740_v46 = vld [vmem:[%s3005_s22 + $0x14] ss:$8 sps:$4 sm:$0xff]  }
 0x726   : > { %v1618_v50 = vpop.permute.xlu1 %1617 }
 0x727   : > { %v1623_v54 = vsel %vm1285_vm5, %v1618_v50, 0 }
 0x728   : > { %v2773_v44 = vpop.eup %2772 }
 0x729   : > { %v1392_v45 = vmul.f32 %v2773_v44, %v2769_v35  ;;  %v2775_v48 = vpop.eup %2774  ;;  %v2737_v44 = vld [vmem:[%s3005_s22 + $0x24] ss:$8 sps:$4 sm:$0xff]  }
 0x72a   : > { %v1504_v30 = vmul.f32 %v2775_v48, %v2767_v33  ;;  %v2725_v33 = vld [vmem:[%s3005_s22 + $0x64] ss:$8 sps:$4 sm:$0xff]  }
 0x72b   : > { %v1393_v47 = vpack.c.bf16 %v1392_v45, %v1392_v45  ;;  %v2735_v45 = vld [vmem:[%s3005_s22 + $0x20] ss:$8 sps:$4 sm:$0xff]   ;;  %v2743_v48 = vld [vmem:[%s3005_s22 + $0x4] ss:$8 sps:$4 sm:$0xff]  }
 0x72c   : > { %v1505_v52 = vpack.c.bf16 %v1504_v30, %v1504_v30  ;;  %v2777_v53 = vpop.eup %2776 }
 0x72d   : > { %2571 = vmatmul.mubr.msk.bf16.vlgmr.msra.gmra.mxu1 %vm1268_vm7, %v1393_v47  ;;  %v1615_v55 = vmul.f32 %v2777_v53, %v2771_v37  ;;  %v2738_v47 = vld [vmem:[%s3005_s22 + $0x10] ss:$8 sps:$4 sm:$0xff]  }
 0x72e   : > { %2581 = vmatpush3.bf16.msra.mxu1 %v1512_v49  ;;  %2582 = vmatprep.mubr.msk.bf16.mxu1 %vm2827_vm3, %v2825_v32  ;;  %v2741_v49 = vld [vmem:[%s3005_s22] ss:$8 sps:$4 sm:$0xff]  }
 0x72f   : > { %2592 = vmatprep.subr.bf16.mxu1 %v2825_v32  ;;  %v1616_v56 = vpack.c.bf16 %v1615_v55, %v1615_v55 }
 0x735   : > { %2583 = vmatmul.mubr.msk.bf16.vlgmr.msra.gmra.mxu1 %vm1268_vm7, %v1505_v52 }
 0x736   : > { %2593 = vmatpush3.bf16.msra.mxu1 %v1623_v54  ;;  %2594 = vmatprep.mubr.msk.bf16.mxu1 %vm2827_vm3, %v2825_v32  ;;  %v2433_v54 = vld [vmem:[%s3366_s1] ss:$0 sm:$0xff] }
 0x737   : > { %1931 = vmatprep.subr.bf16.mxu1 %v2722_v31 }
 0x73d   : > { %2595 = vmatmul.mubr.msk.bf16.vlgmr.msra.gmra.mxu1 %vm1268_vm7, %v1616_v56  ;;  %v2434_v56 = vld [vmem:[%s3367_s3] ss:$0 sm:$0xff] }
 0x73e   : > { %1963 = vmatprep.mubr.bf16.mxu1 %v2826_v51  ;;  %v2717_v51 = vld [vmem:[%s2981_s20 + $0x10] sm:$0xff]   ;;  %1932 = vmatpush1.bf16.msra.mxu1 %v2720_v28 }
 0x73f   : > { %2609 = vmatpush3.bf16.msra.mxu0 %v2717_v51  ;;  %1933 = vmatprep.subr.bf16.mxu1 %v2725_v33  ;;  %v2746_v51 = vld [vmem:[%s3015_s5 + $0x70] sm:$0xff]  }
 0x740   : > { %2610 = vmatprep.subr.bf16.mxu0 %v2825_v32 }
 0x742   : > { %1934 = vmatpush1.bf16.msra.mxu1 %v2723_v34 }
 0x743   : > { %2611 = vmatpush3.bf16.msra.mxu0 %v2718_v63  ;;  %1935 = vmatprep.subr.bf16.mxu1 %v2728_v38  ;;  %v2747_v63 = vld [vmem:[%s3015_s5 + $0x30] sm:$0xff]  }
 0x744   : > { %2612 = vmatprep.subr.bf16.mxu0 %v2825_v32 }
 0x746   : > { %1936 = vmatpush1.bf16.msra.mxu1 %v2726_v39 }
 0x747   : > { %2613 = vmatpush3.bf16.msra.mxu0 %v2719_v2  ;;  %1937 = vmatprep.subr.bf16.mxu1 %v2731_v41  ;;  %v2750_v2 = vld [vmem:[%s3015_s5 + $0x60] sm:$0xff]  }
 0x748   : > { %2508 = vmatprep.subr.bf16.mxu0 %v2744_v60 }
 0x74a   : > { %1938 = vmatpush1.bf16.msra.mxu1 %v2729_v40 }
 0x74b   : > { %1939 = vmatprep.subr.bf16.mxu1 %v2734_v42 }
 0x74e   : > { %1940 = vmatpush1.bf16.msra.mxu1 %v2732_v43  ;;  %v2451_v43 = vld [vmem:[%s752_s28] ss:$0 sm:$0xff] }
 0x74f   : > { %1941 = vmatprep.subr.bf16.mxu1 %v2737_v44 }
 0x752   : > { %1942 = vmatpush1.bf16.msra.mxu1 %v2735_v45 }
 0x753   : > { %1943 = vmatprep.subr.bf16.mxu1 %v2740_v46 }
 0x756   : > { %1944 = vmatpush1.bf16.msra.mxu1 %v2738_v47 }
 0x757   : > { %1945 = vmatprep.subr.bf16.mxu1 %v2743_v48 }
 0x75a   : > { %1946 = vmatpush1.bf16.msra.mxu1 %v2741_v49 }
 0x7ed   : > { %v1437_v0 = vpop.f32.mrf.mxu1 }
 0x7ee   : > { %1666 = vrot.lane.b32.xlu1 %v1437_v0, %s2829_s7  ;;  %v2748_v0 = vld [vmem:[%s3015_s5 + $0x68] sm:$0xff]  }
 0x7ef   : > { %v2572_v1 = vpop.f32.mrf.mxu1 }
 0x7f0   : > { %v2749_v1 = vld [vmem:[%s3015_s5 + $0x28] sm:$0xff]  }
 0x7f1   : > { %v1440_v3 = vpop.f32.mrf.mxu1 }
 0x7f2   : > { %v2751_v3 = vld [vmem:[%s3015_s5 + $0x20] sm:$0xff]  }
 0x7f3   : > { %v2573_v4 = vpop.f32.mrf.mxu1 }
 0x7f4   : > { %v2752_v4 = vld [vmem:[%s3015_s5 + $0x58] sm:$0xff]  }
 0x7f5   : > { %v1548_v5 = vpop.f32.mrf.mxu1 }
 0x7f6   : > { %1670 = vrot.lane.b32.xlu0 %v1548_v5, %s2830_s18  ;;  %v2753_v5 = vld [vmem:[%s3015_s5 + $0x18] sm:$0xff]  }
 0x7f7   : > { %v2584_v6 = vpop.f32.mrf.mxu1 }
 0x7f8   : > { %v2754_v6 = vld [vmem:[%s3015_s5 + $0x50] sm:$0xff]  }
 0x7f9   : > { %v1551_v10 = vpop.f32.mrf.mxu1 }
 0x7fa   : > { %v2755_v10 = vld [vmem:[%s3015_s5 + $0x10] sm:$0xff]  }
 0x7fb   : > { %v2585_v11 = vpop.f32.mrf.mxu1 }
 0x7fc   : > { %v2756_v11 = vld [vmem:[%s3015_s5 + $0x48] sm:$0xff]  }
 0x7fd   : > { %v1659_v12 = vpop.f32.mrf.mxu1 }
 0x7fe   : > { %1674 = vrot.lane.b32.xlu1 %v1659_v12, %s2828_s0  ;;  %v2757_v12 = vld [vmem:[%s3015_s5 + $0x8] sm:$0xff]  }
 0x7ff   : > { %v2596_v13 = vpop.f32.mrf.mxu1 }
 0x800   : > { %v2758_v13 = vld [vmem:[%s3015_s5 + $0x40] sm:$0xff]  }
 0x801   : > { %v1662_v14 = vpop.f32.mrf.mxu1 }
 0x802   : > { %v2759_v14 = vld [vmem:[%s3015_s5] sm:$0xff]  }
 0x803   : > { %v2597_v15 = vpop.f32.mrf.mxu1 }
 0x804   : > { %v1839_v15 = vld [vmem:[%s3010_s27] sm:$0x3] }
 0x860   : > { %v1667_v16 = vpop.permute.xlu1 %1666 }
 0x861   : > { %v1677_v17 = vsel %vm1220_vm4, %v3183_v62, %v1667_v16  ;;  %v1844_v16 = vrot.slane %v1839_v15, %v992_v9 }
 0x868   : > { %v1671_v32 = vpop.permute.xlu0 %1670 }
 0x869   : > { %v1679_v18 = vsel %vm1678_vm8, %v1677_v17, %v1671_v32  ;;  %v1848_v32 = vrot.slane %v1839_v15, %v996_v8 }
 0x870   : > { %v1675_v19 = vpop.permute.xlu1 %1674 }
 0x871   : > { %v1681_v20 = vsel %vm1680_vm9, %v1679_v18, %v1675_v19 }
 0x872   : > { %v1682_v21 = vpack.c.bf16 %v1681_v20, %v1681_v20 }
 0x874   : > { %2615 = vmatmul.mubr.bf16.vlgmr.msra.gmra.mxu0 %v1682_v21 }
 0x875   : > { %2509 = vmatpush3.bf16.msra.mxu0 %v2745_v61 }
 0x876   : > { %2510 = vmatprep.subr.bf16.mxu0 %v2746_v51 }
 0x879   : > { %2511 = vmatpush3.bf16.msra.mxu0 %v2747_v63 }
 0x87a   : > { %2512 = vmatprep.subr.bf16.mxu0 %v2748_v0 }
 0x87d   : > { %2513 = vmatpush3.bf16.msra.mxu0 %v2749_v1 }
 0x87e   : > { %2514 = vmatprep.subr.bf16.mxu0 %v2750_v2 }
 0x881   : > { %2515 = vmatpush3.bf16.msra.mxu0 %v2751_v3 }
 0x882   : > { %2516 = vmatprep.subr.bf16.mxu0 %v2752_v4 }
 0x885   : > { %2517 = vmatpush3.bf16.msra.mxu0 %v2753_v5 }
 0x886   : > { %2518 = vmatprep.subr.bf16.mxu0 %v2754_v6 }
 0x889   : > { %2519 = vmatpush3.bf16.msra.mxu0 %v2755_v10 }
 0x88a   : > { %2520 = vmatprep.subr.bf16.mxu0 %v2756_v11 }
 0x88d   : > { %2521 = vmatpush3.bf16.msra.mxu0 %v2757_v12 }
 0x88e   : > { %2522 = vmatprep.subr.bf16.mxu0 %v2758_v13 }
 0x891   : > { %2523 = vmatpush3.bf16.msra.mxu0 %v2759_v14 }
 0x934   : > { %v1788_v23 = vpop.f32.mrf.mxu0 }
 0x935   : > { %v1789_v24 = vadd.f32 %v2424_v22, %v1788_v23 }
 0x936   : > { %v2616_v25 = vpop.f32.mrf.mxu0 }
 0x937   : > { %v3240_v26 = vadd.f32 %v1789_v24, %v3075_v29 }
 0x938   : > { %v1791_v27 = vpop.f32.mrf.mxu0 }
 0x939   : > { %1797 = vadd.xlane.f32.xlu0 %v3240_v26 }
 0x93a   : > { %v2617_v62 = vpop.f32.mrf.mxu0 }
 0x9c2   : > { %v1798_v29 = vpop.xlane.xlu0 %1797 }
 0x9c3   : > { %v1799_v35 = vmul.f32 0.0078125, %v1798_v29 }
 0x9c5   : > { %v1800_v36 = vsub.f32 %v3240_v26, %v1799_v35 }
 0x9c7   : > { %v1801_v37 = vmul.f32 %v1800_v36, %v1800_v36 }
 0x9c9   : > { %1802 = vadd.xlane.f32.xlu1 %v1801_v37 }
 0xa52   : > { %v1803_v30 = vpop.xlane.xlu1 %1802 }
 0xa53   : > { %v1804_v50 = vmul.f32 0.0078125, %v1803_v30 }
 0xa55   : > { %v1805_v52 = vadd.f32 1e-06, %v1804_v50 }
 0xa57   : > { %2778 = vrsqrt.f32 %v1805_v52 }
 0xa64   : > { %v2779_v53 = vpop.eup %2778 }
 0xa65   : > { %v1807_v55 = vmul.f32 %v2779_v53, %v1800_v36 }
 0xa67   : > { %v1814_v57 = vmul.f32 %v2433_v54, %v1807_v55 }
 0xa69   : > { %v1821_v58 = vadd.f32 %v2434_v56, %v1814_v57 }
 0xa6b   : > { %v1822_v59 = vpack.c.bf16 %v1821_v58, %v1821_v58 }
 0xa6d   : > { %1964 = vmatmul.mubr.bf16.vlgmr.msra.gmra.mxu1 %v1822_v59 }
 0xb2d   : > { %v1965_v17 = vpop.f32.mrf.mxu1 }
 0xb2e   : > { %v1966_v18 = vadd.f32 %v1965_v17, %v1844_v16 }
 0xb2f   : > { %v1967_v19 = vpop.f32.mrf.mxu1 }
 0xb30   : > { %v1974_v20 = vmul.f32 0.044715, %v1966_v18  ;;  %v1968_v21 = vadd.f32 %v1967_v19, %v1848_v32  ;;  %v1972_v35 = vmul.f32 0.5, %v1966_v18 }
 0xb31   : > { %v1969_v22 = vpop.f32.mrf.mxu1 }
 0xb32   : > { %v1976_v23 = vmul.f32 %v1974_v20, %v1966_v18  ;;  %v1975_v24 = vmul.f32 0.044715, %v1968_v21  ;;  %v1973_v36 = vmul.f32 0.5, %v1968_v21 }
 0xb33   : > { %v1970_v25 = vpop.f32.mrf.mxu1 }
 0xb34   : > { %v1978_v27 = vmul.f32 %v1976_v23, %v1966_v18  ;;  %v1977_v62 = vmul.f32 %v1975_v24, %v1968_v21 }
 0xb36   : > { %v1980_v28 = vadd.f32 %v1978_v27, %v1966_v18  ;;  %v1979_v31 = vmul.f32 %v1977_v62, %v1968_v21 }
 0xb38   : > { %v1982_v33 = vmul.f32 0.7978846, %v1980_v28  ;;  %v1981_v34 = vadd.f32 %v1979_v31, %v1968_v21 }
 0xb3a   : > { %v1983_v29 = vmul.f32 0.7978846, %v1981_v34  ;;  %2780 = vtanh.f32 %v1982_v33 }
 0xb3c   : > { %2782 = vtanh.f32 %v1983_v29 }
 0xb47   : > { %v2781_v7 = vpop.eup %2780 }
 0xb48   : > { %v1986_v8 = vadd.f32 1.0, %v2781_v7 }
 0xb49   : > { %v2783_v9 = vpop.eup %2782 }
 0xb4a   : > { %v1987_v37 = vadd.f32 1.0, %v2783_v9  ;;  %v1988_v38 = vmul.f32 %v1986_v8, %v1972_v35 }
 0xb4c   : > { %v1989_v39 = vmul.f32 %v1987_v37, %v1973_v36  ;;  %v1990_v41 = vpack.c.bf16 %v1988_v38, %v1988_v38 }
 0xb4e   : > { %v1991_v40 = vpack.c.bf16 %v1989_v39, %v1989_v39 }
 0xb50   : > { %2159 = vmatprep.mubr.bf16.mxu0 %v1991_v40 }
 0xb51   : > { %2160 = vmatmul.mubr.bf16.vlgmr.msra.gmra.mxu0 %v1990_v41 }
 0xc11   : > { %v2524_v42 = vpop.f32.mrf.mxu0 }
 0xc13   : > { %v2525_v44 = vpop.f32.mrf.mxu0 }
 0xc14   : > { %v2526_v45 = vadd.f32 %v2525_v44, %v2524_v42 }
 0xc15   : > { %v2527_v46 = vpop.f32.mrf.mxu0 }
 0xc16   : > { %v2162_v47 = vadd.f32 %v2526_v45, %v2451_v43 }
 0xc17   : > { %v2528_v48 = vpop.f32.mrf.mxu0 }
 0xc18   : > { %v2167_v49 = vadd.f32 %v2162_v47, %v3240_v26 }
 0xc1a   : > { %2168 = vst [vmem:[%s3024_s9] sm:$0xff] %v2167_v49 }
 0xc1b PF: > { %s3368_s25 = sld [smem:[#allocation5_spill]] }
 0xc1c   : > { %s3369_s24 = sld [smem:[#allocation3_spill]] }
 0xc1d   : > { %s3371_s26 = sld [smem:[#allocation6_spill]] }
 0xc1e   : > { %s3372_s27 = sld [smem:[#allocation7_spill]] }
 0xc21   : > { %s27_s28 = sadd.s32 1, %s3368_s25   ;;  %s3370_s25 = sld [smem:[#allocation4_spill]] }
 0xc22   : > { %p24_p8 = scmp.ge.s32.totalorder %s27_s28, 6  }
 0xc24   :  { %26 = sbr.rel (!%p24_p8) target bundleno = 10 (0xa), region = 158 }

</bundles_post_ra>
